<compile_context>
chip_gen: v5e
topology: v5e:2x2
jax: 0.10.0
libtpu: 0.0.40
codegen_flags: <defaults>
</compile_context>

<pallas_src>
import jax
import jax.numpy as jnp
from jax.experimental import pallas as pl
from jax.experimental.pallas import tpu as pltpu


def cnn_lstm_kernel(xu_ref,      # (T, TB, 3*Din)   time-major, 3-tap-unfolded input
                    w0x_ref,     # (3*Din, 4H)      conv folded into layer-0 input proj
                    b0_ref,      # (1, 4H)          conv_b@wih0 + b0 (gate-reordered)
                    whh0_ref,    # (H, 4H)
                    wih1_ref,    # (H, 4H)
                    whh1_ref,    # (H, 4H)
                    b1_ref,      # (1, 4H)
                    d1w_ref,     # (H, DENSE)
                    d1b_ref,     # (1, DENSE)
                    ow_ref,      # (DENSE, OUT_PAD)
                    ob_ref,      # (1, OUT_PAD)
                    out_ref):    # (TB, OUT_PAD)
    T, TB, K0 = xu_ref.shape
    H = whh0_ref.shape[0]
    G = 4 * H

    # ---- Conv1d + MaxPool1d(1) + layer-0 input projection for ALL timesteps
    #      folded into one well-shaped (T*TB, 3*Din) x (3*Din, 4H) matmul. ----
    xu = xu_ref[...].reshape(T * TB, K0)
    xproj = (jnp.dot(xu, w0x_ref[...], preferred_element_type=jnp.float32)
             + b0_ref[...]).reshape(T, TB, G)          # time-major, (TB,4H) lane-dense tiles

    # Hoist weight loads out of the recurrence.
    whh0 = whh0_ref[...]
    wih1 = wih1_ref[...]
    whh1 = whh1_ref[...]
    b1 = b1_ref[...]

    def gates(z):
        # gate columns pre-permuted to [i, f, o, g]: one sigmoid + one tanh per layer
        s = jax.nn.sigmoid(z[:, :3 * H])
        g = jnp.tanh(z[:, 3 * H:])
        return s[:, :H], s[:, H:2 * H], s[:, 2 * H:], g

    # ---- step 0 peeled: zero initial state, so no recurrent matmuls / carries ----
    i0, f0, o0, g0 = gates(xproj[0])
    c0 = i0 * g0
    h0 = o0 * jnp.tanh(c0)
    z1 = jnp.dot(h0, wih1, preferred_element_type=jnp.float32) + b1
    i1, f1, o1, g1 = gates(z1)
    c1 = i1 * g1
    h1 = o1 * jnp.tanh(c1)

    # T is static and small: full unroll (straight-line code, maximal scheduling
    # visibility). Only h_prev @ whh matmuls remain on the serial per-step chain.
    # TODO(synk): for large T switch to lax.fori_loop over a (T, TB, 4H) VMEM scratch.
    for t in range(1, T):
        # Layer-1 recurrent projection depends only on step t-1's h1 -> off the
        # layer-0 critical path; kept as a standalone op so the scheduler hides it
        # under layer-0's matmul/EUP latency.
        r1 = jnp.dot(h1, whh1, preferred_element_type=jnp.float32)

        # layer 0: only the recurrent matmul sits on the serial chain
        z0 = xproj[t] + jnp.dot(h0, whh0, preferred_element_type=jnp.float32)
        i0, f0, o0, g0 = gates(z0)
        c0 = f0 * c0 + i0 * g0
        h0 = o0 * jnp.tanh(c0)

        # layer 1
        z1 = jnp.dot(h0, wih1, preferred_element_type=jnp.float32) + r1 + b1
        i1, f1, o1, g1 = gates(z1)
        c1 = f1 * c1 + i1 * g1
        h1 = o1 * jnp.tanh(c1)

    # ---- head: dense1 -> dropout(identity) -> relu -> output -> relu ----
    d = jnp.maximum(jnp.dot(h1, d1w_ref[...], preferred_element_type=jnp.float32)
                    + d1b_ref[...], 0.0)
    o = jnp.maximum(jnp.dot(d, ow_ref[...], preferred_element_type=jnp.float32)
                    + ob_ref[...], 0.0)
    out_ref[...] = o.astype(out_ref.dtype)


def _reorder_gates(w):
    """Permute packed-gate columns from PyTorch order [i,f,g,o] to [i,f,o,g]."""
    i, f, g, o = jnp.split(w, 4, axis=-1)
    return jnp.concatenate([i, f, o, g], axis=-1)


@jax.jit
def cnn_lstm_forward(x, p):
    B, T, Din = x.shape
    OUT = p["ow"].shape[1]

    # Batch tile: multiple of 8 sublanes, capped at 128 so bigger batches amortize
    # the small-M recurrent matmuls instead of adding serial grid steps.
    B8 = ((B + 7) // 8) * 8
    TB = min(128, B8)
    B_pad = ((B8 + TB - 1) // TB) * TB
    OUT_PAD = ((OUT + 127) // 128) * 128          # lane-dense output block

    # ---- weight prep (wrapper side, once) ----
    wih0 = _reorder_gates(p["wih0"])
    whh0 = _reorder_gates(p["whh0"])
    b0 = _reorder_gates(p["b0"])
    wih1 = _reorder_gates(p["wih1"])
    whh1 = _reorder_gates(p["whh1"])
    b1 = _reorder_gates(p["b1"])
    # Fold Conv1d(k=3, pad=1) (+ identity MaxPool1d(1)) into layer-0 input projection.
    w0x = p["conv_w"].reshape(3 * Din, -1) @ wih0            # (3*Din, 4H)
    b0f = p["conv_b"] @ wih0 + b0                            # (1, 4H)
    # Lane-pad the tiny output head.
    ow = jnp.pad(p["ow"], ((0, 0), (0, OUT_PAD - OUT)))
    ob = jnp.pad(p["ob"], ((0, 0), (0, OUT_PAD - OUT)))

    # ---- input prep: pad batch to the tile, unfold the 3 conv taps,
    #      go time-major so per-step reads are aligned (TB, 4H) tiles ----
    xb = jnp.pad(x.astype(jnp.float32), ((0, B_pad - B), (0, 0), (0, 0)))
    xp_ = jnp.pad(xb, ((0, 0), (1, 1), (0, 0)))
    xu = jnp.concatenate([xp_[:, k:k + T, :] for k in range(3)], axis=-1)  # (B_pad, T, 3Din)
    xu = jnp.transpose(xu, (1, 0, 2))                                      # (T, B_pad, 3Din)

    grid = (B_pad // TB,)
    out = pl.pallas_call(
        cnn_lstm_kernel,
        out_shape=jax.ShapeDtypeStruct((B_pad, OUT_PAD), jnp.float32),
        grid=grid,
        in_specs=[
            pl.BlockSpec((T, TB, 3 * Din), lambda b: (0, b, 0)),
            pl.BlockSpec(w0x.shape, lambda b: (0, 0)),
            pl.BlockSpec(b0f.shape, lambda b: (0, 0)),
            pl.BlockSpec(whh0.shape, lambda b: (0, 0)),
            pl.BlockSpec(wih1.shape, lambda b: (0, 0)),
            pl.BlockSpec(whh1.shape, lambda b: (0, 0)),
            pl.BlockSpec(b1.shape, lambda b: (0, 0)),
            pl.BlockSpec(p["d1w"].shape, lambda b: (0, 0)),
            pl.BlockSpec(p["d1b"].shape, lambda b: (0, 0)),
            pl.BlockSpec(ow.shape, lambda b: (0, 0)),
            pl.BlockSpec(ob.shape, lambda b: (0, 0)),
        ],
        out_specs=pl.BlockSpec((TB, OUT_PAD), lambda b: (b, 0)),
        compiler_params=pltpu.CompilerParams(dimension_semantics=("parallel",)),
    )(xu, w0x, b0f, whh0, wih1, whh1, b1, p["d1w"], p["d1b"], ow, ob)
    return out[:B, :OUT]


def reference_forward(x, p):
    """Pure-JAX reference of the PyTorch forward (eval mode), canonical weights."""
    B, T, Din = x.shape
    C = p["conv_w"].shape[2]
    H = p["whh0"].shape[0]
    xp = jnp.pad(x, ((0, 0), (1, 1), (0, 0)))
    y = p["conv_b"].reshape(1, 1, C)
    for k in range(3):
        y = y + jnp.einsum("btd,dc->btc", xp[:, k:k + T, :], p["conv_w"][k])

    def cell(xt, h, c, wih, whh, b):
        g = xt @ wih + h @ whh + b
        i = jax.nn.sigmoid(g[:, :H]); f = jax.nn.sigmoid(g[:, H:2 * H])
        gg = jnp.tanh(g[:, 2 * H:3 * H]); o = jax.nn.sigmoid(g[:, 3 * H:])
        c = f * c + i * gg
        return o * jnp.tanh(c), c

    h0 = c0 = h1 = c1 = jnp.zeros((B, H), jnp.float32)
    for t in range(T):
        h0, c0 = cell(y[:, t, :], h0, c0, p["wih0"], p["whh0"], p["b0"])
        h1, c1 = cell(h0, h1, c1, p["wih1"], p["whh1"], p["b1"])
    d = jnp.maximum(h1 @ p["d1w"] + p["d1b"], 0.0)
    return jnp.maximum(d @ p["ow"] + p["ob"], 0.0)


def init_params(key, input_dim, output_dim, cnn_filters=32, lstm_hidden=32, dense_units=256):
    ks = jax.random.split(key, 16)
    u = lambda k, shape, s: jax.random.uniform(k, shape, jnp.float32, -s, s)
    C, H = cnn_filters, lstm_hidden
    return {
        # Conv1d weight (C_out, C_in, 3) stored here as (3, C_in, C_out)
        "conv_w": u(ks[0], (3, input_dim, C), (3 * input_dim) ** -0.5),
        "conv_b": u(ks[1], (1, C), (3 * input_dim) ** -0.5),
        # LSTM layer 0 (input=C) and layer 1 (input=H); gates packed [i,f,g,o]
        "wih0": u(ks[2], (C, 4 * H), H ** -0.5),
        "whh0": u(ks[3], (H, 4 * H), H ** -0.5),
        "b0":  u(ks[4], (1, 4 * H), H ** -0.5),
        "wih1": u(ks[5], (H, 4 * H), H ** -0.5),
        "whh1": u(ks[6], (H, 4 * H), H ** -0.5),
        "b1":  u(ks[7], (1, 4 * H), H ** -0.5),
        # Dense head
        "d1w": u(ks[8], (H, dense_units), H ** -0.5),
        "d1b": u(ks[9], (1, dense_units), H ** -0.5),
        "ow":  u(ks[10], (dense_units, output_dim), dense_units ** -0.5),
        "ob":  u(ks[11], (1, output_dim), dense_units ** -0.5),
    }


if __name__ == "__main__":
    B, T, INPUT_DIM, OUTPUT_DIM = 2, 8, 4, 4
    CNN_FILTERS, LSTM_HIDDEN, DENSE_UNITS = 32, 32, 256

    key = jax.random.PRNGKey(0)
    kx, kp = jax.random.split(key)
    x = jax.random.normal(kx, (B, T, INPUT_DIM), jnp.float32)
    params = init_params(kp, INPUT_DIM, OUTPUT_DIM, CNN_FILTERS, LSTM_HIDDEN, DENSE_UNITS)

    out = jax.block_until_ready(cnn_lstm_forward(x, params))
    ref = reference_forward(x, params)

    assert out.shape == (B, OUTPUT_DIM)
    assert jnp.allclose(out, ref, rtol=1e-3, atol=1e-3), (out, ref)
    print("KERNEL_OK")
</pallas_src>

<mosaic_0001>
module attributes {stable_mosaic.version = 11 : i64} {
  func.func @cnn_lstm_kernel(%arg0: i32, %arg1: memref<8x8x12xf32, #tpu.memory_space<vmem>>, %arg2: memref<12x128xf32, #tpu.memory_space<vmem>>, %arg3: memref<1x128xf32, #tpu.memory_space<vmem>>, %arg4: memref<32x128xf32, #tpu.memory_space<vmem>>, %arg5: memref<32x128xf32, #tpu.memory_space<vmem>>, %arg6: memref<32x128xf32, #tpu.memory_space<vmem>>, %arg7: memref<1x128xf32, #tpu.memory_space<vmem>>, %arg8: memref<32x256xf32, #tpu.memory_space<vmem>>, %arg9: memref<1x256xf32, #tpu.memory_space<vmem>>, %arg10: memref<256x128xf32, #tpu.memory_space<vmem>>, %arg11: memref<1x128xf32, #tpu.memory_space<vmem>>, %arg12: memref<8x128xf32, #tpu.memory_space<vmem>>) attributes {dimension_semantics = [#tpu.dimension_semantics<parallel>], iteration_bounds = array<i64: 1>, scalar_prefetch = 0 : i64, scratch_operands = 0 : i64, tpu.core_type = #tpu.core_type<tc>, window_params = [{transform_indices = @transform_0, window_bounds = array<i64: 8, 8, 12>}, {pipeline_mode = #tpu.pipeline_mode<synchronous>, transform_indices = @transform_1, window_bounds = array<i64: 12, 128>}, {pipeline_mode = #tpu.pipeline_mode<synchronous>, transform_indices = @transform_2, window_bounds = array<i64: 1, 128>}, {pipeline_mode = #tpu.pipeline_mode<synchronous>, transform_indices = @transform_3, window_bounds = array<i64: 32, 128>}, {pipeline_mode = #tpu.pipeline_mode<synchronous>, transform_indices = @transform_4, window_bounds = array<i64: 32, 128>}, {pipeline_mode = #tpu.pipeline_mode<synchronous>, transform_indices = @transform_5, window_bounds = array<i64: 32, 128>}, {pipeline_mode = #tpu.pipeline_mode<synchronous>, transform_indices = @transform_6, window_bounds = array<i64: 1, 128>}, {pipeline_mode = #tpu.pipeline_mode<synchronous>, transform_indices = @transform_7, window_bounds = array<i64: 32, 256>}, {pipeline_mode = #tpu.pipeline_mode<synchronous>, transform_indices = @transform_8, window_bounds = array<i64: 1, 256>}, {pipeline_mode = #tpu.pipeline_mode<synchronous>, transform_indices = @transform_9, window_bounds = array<i64: 256, 128>}, {pipeline_mode = #tpu.pipeline_mode<synchronous>, transform_indices = @transform_10, window_bounds = array<i64: 1, 128>}, {transform_indices = @transform_11, window_bounds = array<i64: 8, 128>}]} {
    %c0 = arith.constant 0 : index
    %c0_0 = arith.constant 0 : index
    %c0_1 = arith.constant 0 : index
    %0 = vector.load %arg1[%c0, %c0_0, %c0_1] : memref<8x8x12xf32, #tpu.memory_space<vmem>>, vector<8x8x12xf32>
    %1 = vector.shape_cast %0 : vector<8x8x12xf32> to vector<64x12xf32>
    %c0_2 = arith.constant 0 : index
    %c0_3 = arith.constant 0 : index
    %2 = vector.load %arg2[%c0_2, %c0_3] : memref<12x128xf32, #tpu.memory_space<vmem>>, vector<12x128xf32>
    %cst = arith.constant dense<0.000000e+00> : vector<64x128xf32>
    %3 = tpu.matmul %1, %2, %cst {dimension_numbers = #tpu.dot_dimension_numbers<[1], [0], [0], [1], [0, 0, 1, 1], [], []>} : vector<64x12xf32>, vector<12x128xf32>, vector<64x128xf32> -> vector<64x128xf32>
    %c0_4 = arith.constant 0 : index
    %c0_5 = arith.constant 0 : index
    %4 = vector.load %arg3[%c0_4, %c0_5] : memref<1x128xf32, #tpu.memory_space<vmem>>, vector<1x128xf32>
    %5 = vector.broadcast %4 : vector<1x128xf32> to vector<64x128xf32>
    %6 = arith.addf %3, %5 : vector<64x128xf32>
    %7 = vector.shape_cast %6 : vector<64x128xf32> to vector<8x8x128xf32>
    %c0_6 = arith.constant 0 : index
    %c0_7 = arith.constant 0 : index
    %8 = vector.load %arg4[%c0_6, %c0_7] : memref<32x128xf32, #tpu.memory_space<vmem>>, vector<32x128xf32>
    %c0_8 = arith.constant 0 : index
    %c0_9 = arith.constant 0 : index
    %9 = vector.load %arg5[%c0_8, %c0_9] : memref<32x128xf32, #tpu.memory_space<vmem>>, vector<32x128xf32>
    %c0_10 = arith.constant 0 : index
    %c0_11 = arith.constant 0 : index
    %10 = vector.load %arg6[%c0_10, %c0_11] : memref<32x128xf32, #tpu.memory_space<vmem>>, vector<32x128xf32>
    %c0_12 = arith.constant 0 : index
    %c0_13 = arith.constant 0 : index
    %11 = vector.load %arg7[%c0_12, %c0_13] : memref<1x128xf32, #tpu.memory_space<vmem>>, vector<1x128xf32>
    %12 = vector.extract_strided_slice %7 {offsets = [0, 0, 0], sizes = [1, 8, 128], strides = [1, 1, 1]} : vector<8x8x128xf32> to vector<1x8x128xf32>
    %13 = vector.shape_cast %12 : vector<1x8x128xf32> to vector<8x128xf32>
    %14 = vector.extract_strided_slice %13 {offsets = [0, 0], sizes = [8, 96], strides = [1, 1]} : vector<8x128xf32> to vector<8x96xf32>
    %15 = arith.negf %14 : vector<8x96xf32>
    %16 = math.exp %15 : vector<8x96xf32>
    %cst_14 = arith.constant 1.000000e+00 : f32
    %17 = vector.broadcast %cst_14 : f32 to vector<8x96xf32>
    %18 = arith.addf %17, %16 : vector<8x96xf32>
    %19 = arith.divf %17, %18 : vector<8x96xf32>
    %20 = vector.extract_strided_slice %13 {offsets = [0, 96], sizes = [8, 32], strides = [1, 1]} : vector<8x128xf32> to vector<8x32xf32>
    %21 = math.tanh %20 : vector<8x32xf32>
    %22 = vector.extract_strided_slice %19 {offsets = [0, 0], sizes = [8, 32], strides = [1, 1]} : vector<8x96xf32> to vector<8x32xf32>
    %23 = vector.extract_strided_slice %19 {offsets = [0, 64], sizes = [8, 32], strides = [1, 1]} : vector<8x96xf32> to vector<8x32xf32>
    %24 = arith.mulf %22, %21 : vector<8x32xf32>
    %25 = math.tanh %24 : vector<8x32xf32>
    %26 = arith.mulf %23, %25 : vector<8x32xf32>
    %cst_15 = arith.constant dense<0.000000e+00> : vector<8x128xf32>
    %27 = tpu.matmul %26, %9, %cst_15 {dimension_numbers = #tpu.dot_dimension_numbers<[1], [0], [0], [1], [0, 0, 1, 1], [], []>} : vector<8x32xf32>, vector<32x128xf32>, vector<8x128xf32> -> vector<8x128xf32>
    %28 = vector.broadcast %11 : vector<1x128xf32> to vector<8x128xf32>
    %29 = arith.addf %27, %28 : vector<8x128xf32>
    %30 = vector.extract_strided_slice %29 {offsets = [0, 0], sizes = [8, 96], strides = [1, 1]} : vector<8x128xf32> to vector<8x96xf32>
    %31 = arith.negf %30 : vector<8x96xf32>
    %32 = math.exp %31 : vector<8x96xf32>
    %cst_16 = arith.constant 1.000000e+00 : f32
    %33 = vector.broadcast %cst_16 : f32 to vector<8x96xf32>
    %34 = arith.addf %33, %32 : vector<8x96xf32>
    %35 = arith.divf %33, %34 : vector<8x96xf32>
    %36 = vector.extract_strided_slice %29 {offsets = [0, 96], sizes = [8, 32], strides = [1, 1]} : vector<8x128xf32> to vector<8x32xf32>
    %37 = math.tanh %36 : vector<8x32xf32>
    %38 = vector.extract_strided_slice %35 {offsets = [0, 0], sizes = [8, 32], strides = [1, 1]} : vector<8x96xf32> to vector<8x32xf32>
    %39 = vector.extract_strided_slice %35 {offsets = [0, 64], sizes = [8, 32], strides = [1, 1]} : vector<8x96xf32> to vector<8x32xf32>
    %40 = arith.mulf %38, %37 : vector<8x32xf32>
    %41 = math.tanh %40 : vector<8x32xf32>
    %42 = arith.mulf %39, %41 : vector<8x32xf32>
    %cst_17 = arith.constant dense<0.000000e+00> : vector<8x128xf32>
    %43 = tpu.matmul %42, %10, %cst_17 {dimension_numbers = #tpu.dot_dimension_numbers<[1], [0], [0], [1], [0, 0, 1, 1], [], []>} : vector<8x32xf32>, vector<32x128xf32>, vector<8x128xf32> -> vector<8x128xf32>
    %44 = vector.extract_strided_slice %7 {offsets = [1, 0, 0], sizes = [1, 8, 128], strides = [1, 1, 1]} : vector<8x8x128xf32> to vector<1x8x128xf32>
    %45 = vector.shape_cast %44 : vector<1x8x128xf32> to vector<8x128xf32>
    %cst_18 = arith.constant dense<0.000000e+00> : vector<8x128xf32>
    %46 = tpu.matmul %26, %8, %cst_18 {dimension_numbers = #tpu.dot_dimension_numbers<[1], [0], [0], [1], [0, 0, 1, 1], [], []>} : vector<8x32xf32>, vector<32x128xf32>, vector<8x128xf32> -> vector<8x128xf32>
    %47 = arith.addf %45, %46 : vector<8x128xf32>
    %48 = vector.extract_strided_slice %47 {offsets = [0, 0], sizes = [8, 96], strides = [1, 1]} : vector<8x128xf32> to vector<8x96xf32>
    %49 = arith.negf %48 : vector<8x96xf32>
    %50 = math.exp %49 : vector<8x96xf32>
    %cst_19 = arith.constant 1.000000e+00 : f32
    %51 = vector.broadcast %cst_19 : f32 to vector<8x96xf32>
    %52 = arith.addf %51, %50 : vector<8x96xf32>
    %53 = arith.divf %51, %52 : vector<8x96xf32>
    %54 = vector.extract_strided_slice %47 {offsets = [0, 96], sizes = [8, 32], strides = [1, 1]} : vector<8x128xf32> to vector<8x32xf32>
    %55 = math.tanh %54 : vector<8x32xf32>
    %56 = vector.extract_strided_slice %53 {offsets = [0, 0], sizes = [8, 32], strides = [1, 1]} : vector<8x96xf32> to vector<8x32xf32>
    %57 = vector.extract_strided_slice %53 {offsets = [0, 32], sizes = [8, 32], strides = [1, 1]} : vector<8x96xf32> to vector<8x32xf32>
    %58 = vector.extract_strided_slice %53 {offsets = [0, 64], sizes = [8, 32], strides = [1, 1]} : vector<8x96xf32> to vector<8x32xf32>
    %59 = arith.mulf %57, %24 : vector<8x32xf32>
    %60 = arith.mulf %56, %55 : vector<8x32xf32>
    %61 = arith.addf %59, %60 : vector<8x32xf32>
    %62 = math.tanh %61 : vector<8x32xf32>
    %63 = arith.mulf %58, %62 : vector<8x32xf32>
    %cst_20 = arith.constant dense<0.000000e+00> : vector<8x128xf32>
    %64 = tpu.matmul %63, %9, %cst_20 {dimension_numbers = #tpu.dot_dimension_numbers<[1], [0], [0], [1], [0, 0, 1, 1], [], []>} : vector<8x32xf32>, vector<32x128xf32>, vector<8x128xf32> -> vector<8x128xf32>
    %65 = arith.addf %64, %43 : vector<8x128xf32>
    %66 = vector.broadcast %11 : vector<1x128xf32> to vector<8x128xf32>
    %67 = arith.addf %65, %66 : vector<8x128xf32>
    %68 = vector.extract_strided_slice %67 {offsets = [0, 0], sizes = [8, 96], strides = [1, 1]} : vector<8x128xf32> to vector<8x96xf32>
    %69 = arith.negf %68 : vector<8x96xf32>
    %70 = math.exp %69 : vector<8x96xf32>
    %cst_21 = arith.constant 1.000000e+00 : f32
    %71 = vector.broadcast %cst_21 : f32 to vector<8x96xf32>
    %72 = arith.addf %71, %70 : vector<8x96xf32>
    %73 = arith.divf %71, %72 : vector<8x96xf32>
    %74 = vector.extract_strided_slice %67 {offsets = [0, 96], sizes = [8, 32], strides = [1, 1]} : vector<8x128xf32> to vector<8x32xf32>
    %75 = math.tanh %74 : vector<8x32xf32>
    %76 = vector.extract_strided_slice %73 {offsets = [0, 0], sizes = [8, 32], strides = [1, 1]} : vector<8x96xf32> to vector<8x32xf32>
    %77 = vector.extract_strided_slice %73 {offsets = [0, 32], sizes = [8, 32], strides = [1, 1]} : vector<8x96xf32> to vector<8x32xf32>
    %78 = vector.extract_strided_slice %73 {offsets = [0, 64], sizes = [8, 32], strides = [1, 1]} : vector<8x96xf32> to vector<8x32xf32>
    %79 = arith.mulf %77, %40 : vector<8x32xf32>
    %80 = arith.mulf %76, %75 : vector<8x32xf32>
    %81 = arith.addf %79, %80 : vector<8x32xf32>
    %82 = math.tanh %81 : vector<8x32xf32>
    %83 = arith.mulf %78, %82 : vector<8x32xf32>
    %cst_22 = arith.constant dense<0.000000e+00> : vector<8x128xf32>
    %84 = tpu.matmul %83, %10, %cst_22 {dimension_numbers = #tpu.dot_dimension_numbers<[1], [0], [0], [1], [0, 0, 1, 1], [], []>} : vector<8x32xf32>, vector<32x128xf32>, vector<8x128xf32> -> vector<8x128xf32>
    %85 = vector.extract_strided_slice %7 {offsets = [2, 0, 0], sizes = [1, 8, 128], strides = [1, 1, 1]} : vector<8x8x128xf32> to vector<1x8x128xf32>
    %86 = vector.shape_cast %85 : vector<1x8x128xf32> to vector<8x128xf32>
    %cst_23 = arith.constant dense<0.000000e+00> : vector<8x128xf32>
    %87 = tpu.matmul %63, %8, %cst_23 {dimension_numbers = #tpu.dot_dimension_numbers<[1], [0], [0], [1], [0, 0, 1, 1], [], []>} : vector<8x32xf32>, vector<32x128xf32>, vector<8x128xf32> -> vector<8x128xf32>
    %88 = arith.addf %86, %87 : vector<8x128xf32>
    %89 = vector.extract_strided_slice %88 {offsets = [0, 0], sizes = [8, 96], strides = [1, 1]} : vector<8x128xf32> to vector<8x96xf32>
    %90 = arith.negf %89 : vector<8x96xf32>
    %91 = math.exp %90 : vector<8x96xf32>
    %cst_24 = arith.constant 1.000000e+00 : f32
    %92 = vector.broadcast %cst_24 : f32 to vector<8x96xf32>
    %93 = arith.addf %92, %91 : vector<8x96xf32>
    %94 = arith.divf %92, %93 : vector<8x96xf32>
    %95 = vector.extract_strided_slice %88 {offsets = [0, 96], sizes = [8, 32], strides = [1, 1]} : vector<8x128xf32> to vector<8x32xf32>
    %96 = math.tanh %95 : vector<8x32xf32>
    %97 = vector.extract_strided_slice %94 {offsets = [0, 0], sizes = [8, 32], strides = [1, 1]} : vector<8x96xf32> to vector<8x32xf32>
    %98 = vector.extract_strided_slice %94 {offsets = [0, 32], sizes = [8, 32], strides = [1, 1]} : vector<8x96xf32> to vector<8x32xf32>
    %99 = vector.extract_strided_slice %94 {offsets = [0, 64], sizes = [8, 32], strides = [1, 1]} : vector<8x96xf32> to vector<8x32xf32>
    %100 = arith.mulf %98, %61 : vector<8x32xf32>
    %101 = arith.mulf %97, %96 : vector<8x32xf32>
    %102 = arith.addf %100, %101 : vector<8x32xf32>
    %103 = math.tanh %102 : vector<8x32xf32>
    %104 = arith.mulf %99, %103 : vector<8x32xf32>
    %cst_25 = arith.constant dense<0.000000e+00> : vector<8x128xf32>
    %105 = tpu.matmul %104, %9, %cst_25 {dimension_numbers = #tpu.dot_dimension_numbers<[1], [0], [0], [1], [0, 0, 1, 1], [], []>} : vector<8x32xf32>, vector<32x128xf32>, vector<8x128xf32> -> vector<8x128xf32>
    %106 = arith.addf %105, %84 : vector<8x128xf32>
    %107 = vector.broadcast %11 : vector<1x128xf32> to vector<8x128xf32>
    %108 = arith.addf %106, %107 : vector<8x128xf32>
    %109 = vector.extract_strided_slice %108 {offsets = [0, 0], sizes = [8, 96], strides = [1, 1]} : vector<8x128xf32> to vector<8x96xf32>
    %110 = arith.negf %109 : vector<8x96xf32>
    %111 = math.exp %110 : vector<8x96xf32>
    %cst_26 = arith.constant 1.000000e+00 : f32
    %112 = vector.broadcast %cst_26 : f32 to vector<8x96xf32>
    %113 = arith.addf %112, %111 : vector<8x96xf32>
    %114 = arith.divf %112, %113 : vector<8x96xf32>
    %115 = vector.extract_strided_slice %108 {offsets = [0, 96], sizes = [8, 32], strides = [1, 1]} : vector<8x128xf32> to vector<8x32xf32>
    %116 = math.tanh %115 : vector<8x32xf32>
    %117 = vector.extract_strided_slice %114 {offsets = [0, 0], sizes = [8, 32], strides = [1, 1]} : vector<8x96xf32> to vector<8x32xf32>
    %118 = vector.extract_strided_slice %114 {offsets = [0, 32], sizes = [8, 32], strides = [1, 1]} : vector<8x96xf32> to vector<8x32xf32>
    %119 = vector.extract_strided_slice %114 {offsets = [0, 64], sizes = [8, 32], strides = [1, 1]} : vector<8x96xf32> to vector<8x32xf32>
    %120 = arith.mulf %118, %81 : vector<8x32xf32>
    %121 = arith.mulf %117, %116 : vector<8x32xf32>
    %122 = arith.addf %120, %121 : vector<8x32xf32>
    %123 = math.tanh %122 : vector<8x32xf32>
    %124 = arith.mulf %119, %123 : vector<8x32xf32>
    %cst_27 = arith.constant dense<0.000000e+00> : vector<8x128xf32>
    %125 = tpu.matmul %124, %10, %cst_27 {dimension_numbers = #tpu.dot_dimension_numbers<[1], [0], [0], [1], [0, 0, 1, 1], [], []>} : vector<8x32xf32>, vector<32x128xf32>, vector<8x128xf32> -> vector<8x128xf32>
    %126 = vector.extract_strided_slice %7 {offsets = [3, 0, 0], sizes = [1, 8, 128], strides = [1, 1, 1]} : vector<8x8x128xf32> to vector<1x8x128xf32>
    %127 = vector.shape_cast %126 : vector<1x8x128xf32> to vector<8x128xf32>
    %cst_28 = arith.constant dense<0.000000e+00> : vector<8x128xf32>
    %128 = tpu.matmul %104, %8, %cst_28 {dimension_numbers = #tpu.dot_dimension_numbers<[1], [0], [0], [1], [0, 0, 1, 1], [], []>} : vector<8x32xf32>, vector<32x128xf32>, vector<8x128xf32> -> vector<8x128xf32>
    %129 = arith.addf %127, %128 : vector<8x128xf32>
    %130 = vector.extract_strided_slice %129 {offsets = [0, 0], sizes = [8, 96], strides = [1, 1]} : vector<8x128xf32> to vector<8x96xf32>
    %131 = arith.negf %130 : vector<8x96xf32>
    %132 = math.exp %131 : vector<8x96xf32>
    %cst_29 = arith.constant 1.000000e+00 : f32
    %133 = vector.broadcast %cst_29 : f32 to vector<8x96xf32>
    %134 = arith.addf %133, %132 : vector<8x96xf32>
    %135 = arith.divf %133, %134 : vector<8x96xf32>
    %136 = vector.extract_strided_slice %129 {offsets = [0, 96], sizes = [8, 32], strides = [1, 1]} : vector<8x128xf32> to vector<8x32xf32>
    %137 = math.tanh %136 : vector<8x32xf32>
    %138 = vector.extract_strided_slice %135 {offsets = [0, 0], sizes = [8, 32], strides = [1, 1]} : vector<8x96xf32> to vector<8x32xf32>
    %139 = vector.extract_strided_slice %135 {offsets = [0, 32], sizes = [8, 32], strides = [1, 1]} : vector<8x96xf32> to vector<8x32xf32>
    %140 = vector.extract_strided_slice %135 {offsets = [0, 64], sizes = [8, 32], strides = [1, 1]} : vector<8x96xf32> to vector<8x32xf32>
    %141 = arith.mulf %139, %102 : vector<8x32xf32>
    %142 = arith.mulf %138, %137 : vector<8x32xf32>
    %143 = arith.addf %141, %142 : vector<8x32xf32>
    %144 = math.tanh %143 : vector<8x32xf32>
    %145 = arith.mulf %140, %144 : vector<8x32xf32>
    %cst_30 = arith.constant dense<0.000000e+00> : vector<8x128xf32>
    %146 = tpu.matmul %145, %9, %cst_30 {dimension_numbers = #tpu.dot_dimension_numbers<[1], [0], [0], [1], [0, 0, 1, 1], [], []>} : vector<8x32xf32>, vector<32x128xf32>, vector<8x128xf32> -> vector<8x128xf32>
    %147 = arith.addf %146, %125 : vector<8x128xf32>
    %148 = vector.broadcast %11 : vector<1x128xf32> to vector<8x128xf32>
    %149 = arith.addf %147, %148 : vector<8x128xf32>
    %150 = vector.extract_strided_slice %149 {offsets = [0, 0], sizes = [8, 96], strides = [1, 1]} : vector<8x128xf32> to vector<8x96xf32>
    %151 = arith.negf %150 : vector<8x96xf32>
    %152 = math.exp %151 : vector<8x96xf32>
    %cst_31 = arith.constant 1.000000e+00 : f32
    %153 = vector.broadcast %cst_31 : f32 to vector<8x96xf32>
    %154 = arith.addf %153, %152 : vector<8x96xf32>
    %155 = arith.divf %153, %154 : vector<8x96xf32>
    %156 = vector.extract_strided_slice %149 {offsets = [0, 96], sizes = [8, 32], strides = [1, 1]} : vector<8x128xf32> to vector<8x32xf32>
    %157 = math.tanh %156 : vector<8x32xf32>
    %158 = vector.extract_strided_slice %155 {offsets = [0, 0], sizes = [8, 32], strides = [1, 1]} : vector<8x96xf32> to vector<8x32xf32>
    %159 = vector.extract_strided_slice %155 {offsets = [0, 32], sizes = [8, 32], strides = [1, 1]} : vector<8x96xf32> to vector<8x32xf32>
    %160 = vector.extract_strided_slice %155 {offsets = [0, 64], sizes = [8, 32], strides = [1, 1]} : vector<8x96xf32> to vector<8x32xf32>
    %161 = arith.mulf %159, %122 : vector<8x32xf32>
    %162 = arith.mulf %158, %157 : vector<8x32xf32>
    %163 = arith.addf %161, %162 : vector<8x32xf32>
    %164 = math.tanh %163 : vector<8x32xf32>
    %165 = arith.mulf %160, %164 : vector<8x32xf32>
    %cst_32 = arith.constant dense<0.000000e+00> : vector<8x128xf32>
    %166 = tpu.matmul %165, %10, %cst_32 {dimension_numbers = #tpu.dot_dimension_numbers<[1], [0], [0], [1], [0, 0, 1, 1], [], []>} : vector<8x32xf32>, vector<32x128xf32>, vector<8x128xf32> -> vector<8x128xf32>
    %167 = vector.extract_strided_slice %7 {offsets = [4, 0, 0], sizes = [1, 8, 128], strides = [1, 1, 1]} : vector<8x8x128xf32> to vector<1x8x128xf32>
    %168 = vector.shape_cast %167 : vector<1x8x128xf32> to vector<8x128xf32>
    %cst_33 = arith.constant dense<0.000000e+00> : vector<8x128xf32>
    %169 = tpu.matmul %145, %8, %cst_33 {dimension_numbers = #tpu.dot_dimension_numbers<[1], [0], [0], [1], [0, 0, 1, 1], [], []>} : vector<8x32xf32>, vector<32x128xf32>, vector<8x128xf32> -> vector<8x128xf32>
    %170 = arith.addf %168, %169 : vector<8x128xf32>
    %171 = vector.extract_strided_slice %170 {offsets = [0, 0], sizes = [8, 96], strides = [1, 1]} : vector<8x128xf32> to vector<8x96xf32>
    %172 = arith.negf %171 : vector<8x96xf32>
    %173 = math.exp %172 : vector<8x96xf32>
    %cst_34 = arith.constant 1.000000e+00 : f32
    %174 = vector.broadcast %cst_34 : f32 to vector<8x96xf32>
    %175 = arith.addf %174, %173 : vector<8x96xf32>
    %176 = arith.divf %174, %175 : vector<8x96xf32>
    %177 = vector.extract_strided_slice %170 {offsets = [0, 96], sizes = [8, 32], strides = [1, 1]} : vector<8x128xf32> to vector<8x32xf32>
    %178 = math.tanh %177 : vector<8x32xf32>
    %179 = vector.extract_strided_slice %176 {offsets = [0, 0], sizes = [8, 32], strides = [1, 1]} : vector<8x96xf32> to vector<8x32xf32>
    %180 = vector.extract_strided_slice %176 {offsets = [0, 32], sizes = [8, 32], strides = [1, 1]} : vector<8x96xf32> to vector<8x32xf32>
    %181 = vector.extract_strided_slice %176 {offsets = [0, 64], sizes = [8, 32], strides = [1, 1]} : vector<8x96xf32> to vector<8x32xf32>
    %182 = arith.mulf %180, %143 : vector<8x32xf32>
    %183 = arith.mulf %179, %178 : vector<8x32xf32>
    %184 = arith.addf %182, %183 : vector<8x32xf32>
    %185 = math.tanh %184 : vector<8x32xf32>
    %186 = arith.mulf %181, %185 : vector<8x32xf32>
    %cst_35 = arith.constant dense<0.000000e+00> : vector<8x128xf32>
    %187 = tpu.matmul %186, %9, %cst_35 {dimension_numbers = #tpu.dot_dimension_numbers<[1], [0], [0], [1], [0, 0, 1, 1], [], []>} : vector<8x32xf32>, vector<32x128xf32>, vector<8x128xf32> -> vector<8x128xf32>
    %188 = arith.addf %187, %166 : vector<8x128xf32>
    %189 = vector.broadcast %11 : vector<1x128xf32> to vector<8x128xf32>
    %190 = arith.addf %188, %189 : vector<8x128xf32>
    %191 = vector.extract_strided_slice %190 {offsets = [0, 0], sizes = [8, 96], strides = [1, 1]} : vector<8x128xf32> to vector<8x96xf32>
    %192 = arith.negf %191 : vector<8x96xf32>
    %193 = math.exp %192 : vector<8x96xf32>
    %cst_36 = arith.constant 1.000000e+00 : f32
    %194 = vector.broadcast %cst_36 : f32 to vector<8x96xf32>
    %195 = arith.addf %194, %193 : vector<8x96xf32>
    %196 = arith.divf %194, %195 : vector<8x96xf32>
    %197 = vector.extract_strided_slice %190 {offsets = [0, 96], sizes = [8, 32], strides = [1, 1]} : vector<8x128xf32> to vector<8x32xf32>
    %198 = math.tanh %197 : vector<8x32xf32>
    %199 = vector.extract_strided_slice %196 {offsets = [0, 0], sizes = [8, 32], strides = [1, 1]} : vector<8x96xf32> to vector<8x32xf32>
    %200 = vector.extract_strided_slice %196 {offsets = [0, 32], sizes = [8, 32], strides = [1, 1]} : vector<8x96xf32> to vector<8x32xf32>
    %201 = vector.extract_strided_slice %196 {offsets = [0, 64], sizes = [8, 32], strides = [1, 1]} : vector<8x96xf32> to vector<8x32xf32>
    %202 = arith.mulf %200, %163 : vector<8x32xf32>
    %203 = arith.mulf %199, %198 : vector<8x32xf32>
    %204 = arith.addf %202, %203 : vector<8x32xf32>
    %205 = math.tanh %204 : vector<8x32xf32>
    %206 = arith.mulf %201, %205 : vector<8x32xf32>
    %cst_37 = arith.constant dense<0.000000e+00> : vector<8x128xf32>
    %207 = tpu.matmul %206, %10, %cst_37 {dimension_numbers = #tpu.dot_dimension_numbers<[1], [0], [0], [1], [0, 0, 1, 1], [], []>} : vector<8x32xf32>, vector<32x128xf32>, vector<8x128xf32> -> vector<8x128xf32>
    %208 = vector.extract_strided_slice %7 {offsets = [5, 0, 0], sizes = [1, 8, 128], strides = [1, 1, 1]} : vector<8x8x128xf32> to vector<1x8x128xf32>
    %209 = vector.shape_cast %208 : vector<1x8x128xf32> to vector<8x128xf32>
    %cst_38 = arith.constant dense<0.000000e+00> : vector<8x128xf32>
    %210 = tpu.matmul %186, %8, %cst_38 {dimension_numbers = #tpu.dot_dimension_numbers<[1], [0], [0], [1], [0, 0, 1, 1], [], []>} : vector<8x32xf32>, vector<32x128xf32>, vector<8x128xf32> -> vector<8x128xf32>
    %211 = arith.addf %209, %210 : vector<8x128xf32>
    %212 = vector.extract_strided_slice %211 {offsets = [0, 0], sizes = [8, 96], strides = [1, 1]} : vector<8x128xf32> to vector<8x96xf32>
    %213 = arith.negf %212 : vector<8x96xf32>
    %214 = math.exp %213 : vector<8x96xf32>
    %cst_39 = arith.constant 1.000000e+00 : f32
    %215 = vector.broadcast %cst_39 : f32 to vector<8x96xf32>
    %216 = arith.addf %215, %214 : vector<8x96xf32>
    %217 = arith.divf %215, %216 : vector<8x96xf32>
    %218 = vector.extract_strided_slice %211 {offsets = [0, 96], sizes = [8, 32], strides = [1, 1]} : vector<8x128xf32> to vector<8x32xf32>
    %219 = math.tanh %218 : vector<8x32xf32>
    %220 = vector.extract_strided_slice %217 {offsets = [0, 0], sizes = [8, 32], strides = [1, 1]} : vector<8x96xf32> to vector<8x32xf32>
    %221 = vector.extract_strided_slice %217 {offsets = [0, 32], sizes = [8, 32], strides = [1, 1]} : vector<8x96xf32> to vector<8x32xf32>
    %222 = vector.extract_strided_slice %217 {offsets = [0, 64], sizes = [8, 32], strides = [1, 1]} : vector<8x96xf32> to vector<8x32xf32>
    %223 = arith.mulf %221, %184 : vector<8x32xf32>
    %224 = arith.mulf %220, %219 : vector<8x32xf32>
    %225 = arith.addf %223, %224 : vector<8x32xf32>
    %226 = math.tanh %225 : vector<8x32xf32>
    %227 = arith.mulf %222, %226 : vector<8x32xf32>
    %cst_40 = arith.constant dense<0.000000e+00> : vector<8x128xf32>
    %228 = tpu.matmul %227, %9, %cst_40 {dimension_numbers = #tpu.dot_dimension_numbers<[1], [0], [0], [1], [0, 0, 1, 1], [], []>} : vector<8x32xf32>, vector<32x128xf32>, vector<8x128xf32> -> vector<8x128xf32>
    %229 = arith.addf %228, %207 : vector<8x128xf32>
    %230 = vector.broadcast %11 : vector<1x128xf32> to vector<8x128xf32>
    %231 = arith.addf %229, %230 : vector<8x128xf32>
    %232 = vector.extract_strided_slice %231 {offsets = [0, 0], sizes = [8, 96], strides = [1, 1]} : vector<8x128xf32> to vector<8x96xf32>
    %233 = arith.negf %232 : vector<8x96xf32>
    %234 = math.exp %233 : vector<8x96xf32>
    %cst_41 = arith.constant 1.000000e+00 : f32
    %235 = vector.broadcast %cst_41 : f32 to vector<8x96xf32>
    %236 = arith.addf %235, %234 : vector<8x96xf32>
    %237 = arith.divf %235, %236 : vector<8x96xf32>
    %238 = vector.extract_strided_slice %231 {offsets = [0, 96], sizes = [8, 32], strides = [1, 1]} : vector<8x128xf32> to vector<8x32xf32>
    %239 = math.tanh %238 : vector<8x32xf32>
    %240 = vector.extract_strided_slice %237 {offsets = [0, 0], sizes = [8, 32], strides = [1, 1]} : vector<8x96xf32> to vector<8x32xf32>
    %241 = vector.extract_strided_slice %237 {offsets = [0, 32], sizes = [8, 32], strides = [1, 1]} : vector<8x96xf32> to vector<8x32xf32>
    %242 = vector.extract_strided_slice %237 {offsets = [0, 64], sizes = [8, 32], strides = [1, 1]} : vector<8x96xf32> to vector<8x32xf32>
    %243 = arith.mulf %241, %204 : vector<8x32xf32>
    %244 = arith.mulf %240, %239 : vector<8x32xf32>
    %245 = arith.addf %243, %244 : vector<8x32xf32>
    %246 = math.tanh %245 : vector<8x32xf32>
    %247 = arith.mulf %242, %246 : vector<8x32xf32>
    %cst_42 = arith.constant dense<0.000000e+00> : vector<8x128xf32>
    %248 = tpu.matmul %247, %10, %cst_42 {dimension_numbers = #tpu.dot_dimension_numbers<[1], [0], [0], [1], [0, 0, 1, 1], [], []>} : vector<8x32xf32>, vector<32x128xf32>, vector<8x128xf32> -> vector<8x128xf32>
    %249 = vector.extract_strided_slice %7 {offsets = [6, 0, 0], sizes = [1, 8, 128], strides = [1, 1, 1]} : vector<8x8x128xf32> to vector<1x8x128xf32>
    %250 = vector.shape_cast %249 : vector<1x8x128xf32> to vector<8x128xf32>
    %cst_43 = arith.constant dense<0.000000e+00> : vector<8x128xf32>
    %251 = tpu.matmul %227, %8, %cst_43 {dimension_numbers = #tpu.dot_dimension_numbers<[1], [0], [0], [1], [0, 0, 1, 1], [], []>} : vector<8x32xf32>, vector<32x128xf32>, vector<8x128xf32> -> vector<8x128xf32>
    %252 = arith.addf %250, %251 : vector<8x128xf32>
    %253 = vector.extract_strided_slice %252 {offsets = [0, 0], sizes = [8, 96], strides = [1, 1]} : vector<8x128xf32> to vector<8x96xf32>
    %254 = arith.negf %253 : vector<8x96xf32>
    %255 = math.exp %254 : vector<8x96xf32>
    %cst_44 = arith.constant 1.000000e+00 : f32
    %256 = vector.broadcast %cst_44 : f32 to vector<8x96xf32>
    %257 = arith.addf %256, %255 : vector<8x96xf32>
    %258 = arith.divf %256, %257 : vector<8x96xf32>
    %259 = vector.extract_strided_slice %252 {offsets = [0, 96], sizes = [8, 32], strides = [1, 1]} : vector<8x128xf32> to vector<8x32xf32>
    %260 = math.tanh %259 : vector<8x32xf32>
    %261 = vector.extract_strided_slice %258 {offsets = [0, 0], sizes = [8, 32], strides = [1, 1]} : vector<8x96xf32> to vector<8x32xf32>
    %262 = vector.extract_strided_slice %258 {offsets = [0, 32], sizes = [8, 32], strides = [1, 1]} : vector<8x96xf32> to vector<8x32xf32>
    %263 = vector.extract_strided_slice %258 {offsets = [0, 64], sizes = [8, 32], strides = [1, 1]} : vector<8x96xf32> to vector<8x32xf32>
    %264 = arith.mulf %262, %225 : vector<8x32xf32>
    %265 = arith.mulf %261, %260 : vector<8x32xf32>
    %266 = arith.addf %264, %265 : vector<8x32xf32>
    %267 = math.tanh %266 : vector<8x32xf32>
    %268 = arith.mulf %263, %267 : vector<8x32xf32>
    %cst_45 = arith.constant dense<0.000000e+00> : vector<8x128xf32>
    %269 = tpu.matmul %268, %9, %cst_45 {dimension_numbers = #tpu.dot_dimension_numbers<[1], [0], [0], [1], [0, 0, 1, 1], [], []>} : vector<8x32xf32>, vector<32x128xf32>, vector<8x128xf32> -> vector<8x128xf32>
    %270 = arith.addf %269, %248 : vector<8x128xf32>
    %271 = vector.broadcast %11 : vector<1x128xf32> to vector<8x128xf32>
    %272 = arith.addf %270, %271 : vector<8x128xf32>
    %273 = vector.extract_strided_slice %272 {offsets = [0, 0], sizes = [8, 96], strides = [1, 1]} : vector<8x128xf32> to vector<8x96xf32>
    %274 = arith.negf %273 : vector<8x96xf32>
    %275 = math.exp %274 : vector<8x96xf32>
    %cst_46 = arith.constant 1.000000e+00 : f32
    %276 = vector.broadcast %cst_46 : f32 to vector<8x96xf32>
    %277 = arith.addf %276, %275 : vector<8x96xf32>
    %278 = arith.divf %276, %277 : vector<8x96xf32>
    %279 = vector.extract_strided_slice %272 {offsets = [0, 96], sizes = [8, 32], strides = [1, 1]} : vector<8x128xf32> to vector<8x32xf32>
    %280 = math.tanh %279 : vector<8x32xf32>
    %281 = vector.extract_strided_slice %278 {offsets = [0, 0], sizes = [8, 32], strides = [1, 1]} : vector<8x96xf32> to vector<8x32xf32>
    %282 = vector.extract_strided_slice %278 {offsets = [0, 32], sizes = [8, 32], strides = [1, 1]} : vector<8x96xf32> to vector<8x32xf32>
    %283 = vector.extract_strided_slice %278 {offsets = [0, 64], sizes = [8, 32], strides = [1, 1]} : vector<8x96xf32> to vector<8x32xf32>
    %284 = arith.mulf %282, %245 : vector<8x32xf32>
    %285 = arith.mulf %281, %280 : vector<8x32xf32>
    %286 = arith.addf %284, %285 : vector<8x32xf32>
    %287 = math.tanh %286 : vector<8x32xf32>
    %288 = arith.mulf %283, %287 : vector<8x32xf32>
    %cst_47 = arith.constant dense<0.000000e+00> : vector<8x128xf32>
    %289 = tpu.matmul %288, %10, %cst_47 {dimension_numbers = #tpu.dot_dimension_numbers<[1], [0], [0], [1], [0, 0, 1, 1], [], []>} : vector<8x32xf32>, vector<32x128xf32>, vector<8x128xf32> -> vector<8x128xf32>
    %290 = vector.extract_strided_slice %7 {offsets = [7, 0, 0], sizes = [1, 8, 128], strides = [1, 1, 1]} : vector<8x8x128xf32> to vector<1x8x128xf32>
    %291 = vector.shape_cast %290 : vector<1x8x128xf32> to vector<8x128xf32>
    %cst_48 = arith.constant dense<0.000000e+00> : vector<8x128xf32>
    %292 = tpu.matmul %268, %8, %cst_48 {dimension_numbers = #tpu.dot_dimension_numbers<[1], [0], [0], [1], [0, 0, 1, 1], [], []>} : vector<8x32xf32>, vector<32x128xf32>, vector<8x128xf32> -> vector<8x128xf32>
    %293 = arith.addf %291, %292 : vector<8x128xf32>
    %294 = vector.extract_strided_slice %293 {offsets = [0, 0], sizes = [8, 96], strides = [1, 1]} : vector<8x128xf32> to vector<8x96xf32>
    %295 = arith.negf %294 : vector<8x96xf32>
    %296 = math.exp %295 : vector<8x96xf32>
    %cst_49 = arith.constant 1.000000e+00 : f32
    %297 = vector.broadcast %cst_49 : f32 to vector<8x96xf32>
    %298 = arith.addf %297, %296 : vector<8x96xf32>
    %299 = arith.divf %297, %298 : vector<8x96xf32>
    %300 = vector.extract_strided_slice %293 {offsets = [0, 96], sizes = [8, 32], strides = [1, 1]} : vector<8x128xf32> to vector<8x32xf32>
    %301 = math.tanh %300 : vector<8x32xf32>
    %302 = vector.extract_strided_slice %299 {offsets = [0, 0], sizes = [8, 32], strides = [1, 1]} : vector<8x96xf32> to vector<8x32xf32>
    %303 = vector.extract_strided_slice %299 {offsets = [0, 32], sizes = [8, 32], strides = [1, 1]} : vector<8x96xf32> to vector<8x32xf32>
    %304 = vector.extract_strided_slice %299 {offsets = [0, 64], sizes = [8, 32], strides = [1, 1]} : vector<8x96xf32> to vector<8x32xf32>
    %305 = arith.mulf %303, %266 : vector<8x32xf32>
    %306 = arith.mulf %302, %301 : vector<8x32xf32>
    %307 = arith.addf %305, %306 : vector<8x32xf32>
    %308 = math.tanh %307 : vector<8x32xf32>
    %309 = arith.mulf %304, %308 : vector<8x32xf32>
    %cst_50 = arith.constant dense<0.000000e+00> : vector<8x128xf32>
    %310 = tpu.matmul %309, %9, %cst_50 {dimension_numbers = #tpu.dot_dimension_numbers<[1], [0], [0], [1], [0, 0, 1, 1], [], []>} : vector<8x32xf32>, vector<32x128xf32>, vector<8x128xf32> -> vector<8x128xf32>
    %311 = arith.addf %310, %289 : vector<8x128xf32>
    %312 = vector.broadcast %11 : vector<1x128xf32> to vector<8x128xf32>
    %313 = arith.addf %311, %312 : vector<8x128xf32>
    %314 = vector.extract_strided_slice %313 {offsets = [0, 0], sizes = [8, 96], strides = [1, 1]} : vector<8x128xf32> to vector<8x96xf32>
    %315 = arith.negf %314 : vector<8x96xf32>
    %316 = math.exp %315 : vector<8x96xf32>
    %cst_51 = arith.constant 1.000000e+00 : f32
    %317 = vector.broadcast %cst_51 : f32 to vector<8x96xf32>
    %318 = arith.addf %317, %316 : vector<8x96xf32>
    %319 = arith.divf %317, %318 : vector<8x96xf32>
    %320 = vector.extract_strided_slice %313 {offsets = [0, 96], sizes = [8, 32], strides = [1, 1]} : vector<8x128xf32> to vector<8x32xf32>
    %321 = math.tanh %320 : vector<8x32xf32>
    %322 = vector.extract_strided_slice %319 {offsets = [0, 0], sizes = [8, 32], strides = [1, 1]} : vector<8x96xf32> to vector<8x32xf32>
    %323 = vector.extract_strided_slice %319 {offsets = [0, 32], sizes = [8, 32], strides = [1, 1]} : vector<8x96xf32> to vector<8x32xf32>
    %324 = vector.extract_strided_slice %319 {offsets = [0, 64], sizes = [8, 32], strides = [1, 1]} : vector<8x96xf32> to vector<8x32xf32>
    %325 = arith.mulf %323, %286 : vector<8x32xf32>
    %326 = arith.mulf %322, %321 : vector<8x32xf32>
    %327 = arith.addf %325, %326 : vector<8x32xf32>
    %328 = math.tanh %327 : vector<8x32xf32>
    %329 = arith.mulf %324, %328 : vector<8x32xf32>
    %c0_52 = arith.constant 0 : index
    %c0_53 = arith.constant 0 : index
    %330 = vector.load %arg8[%c0_52, %c0_53] : memref<32x256xf32, #tpu.memory_space<vmem>>, vector<32x256xf32>
    %cst_54 = arith.constant dense<0.000000e+00> : vector<8x256xf32>
    %331 = tpu.matmul %329, %330, %cst_54 {dimension_numbers = #tpu.dot_dimension_numbers<[1], [0], [0], [1], [0, 0, 1, 1], [], []>} : vector<8x32xf32>, vector<32x256xf32>, vector<8x256xf32> -> vector<8x256xf32>
    %c0_55 = arith.constant 0 : index
    %c0_56 = arith.constant 0 : index
    %332 = vector.load %arg9[%c0_55, %c0_56] : memref<1x256xf32, #tpu.memory_space<vmem>>, vector<1x256xf32>
    %333 = vector.broadcast %332 : vector<1x256xf32> to vector<8x256xf32>
    %334 = arith.addf %331, %333 : vector<8x256xf32>
    %cst_57 = arith.constant 0.000000e+00 : f32
    %335 = vector.broadcast %cst_57 : f32 to vector<8x256xf32>
    %336 = arith.maximumf %334, %335 : vector<8x256xf32>
    %c0_58 = arith.constant 0 : index
    %c0_59 = arith.constant 0 : index
    %337 = vector.load %arg10[%c0_58, %c0_59] : memref<256x128xf32, #tpu.memory_space<vmem>>, vector<256x128xf32>
    %cst_60 = arith.constant dense<0.000000e+00> : vector<8x128xf32>
    %338 = tpu.matmul %336, %337, %cst_60 {dimension_numbers = #tpu.dot_dimension_numbers<[1], [0], [0], [1], [0, 0, 1, 1], [], []>} : vector<8x256xf32>, vector<256x128xf32>, vector<8x128xf32> -> vector<8x128xf32>
    %c0_61 = arith.constant 0 : index
    %c0_62 = arith.constant 0 : index
    %339 = vector.load %arg11[%c0_61, %c0_62] : memref<1x128xf32, #tpu.memory_space<vmem>>, vector<1x128xf32>
    %340 = vector.broadcast %339 : vector<1x128xf32> to vector<8x128xf32>
    %341 = arith.addf %338, %340 : vector<8x128xf32>
    %cst_63 = arith.constant 0.000000e+00 : f32
    %342 = vector.broadcast %cst_63 : f32 to vector<8x128xf32>
    %343 = arith.maximumf %341, %342 : vector<8x128xf32>
    %c0_64 = arith.constant 0 : index
    %c0_65 = arith.constant 0 : index
    %344 = vector.load %arg12[%c0_64, %c0_65] : memref<8x128xf32, #tpu.memory_space<vmem>>, vector<8x128xf32>
    tpu.vector_store %arg12[%c0_64, %c0_65], %343 {strides = array<i32>} : memref<8x128xf32, #tpu.memory_space<vmem>>, vector<8x128xf32>,
    return
  }
  func.func @transform_0(%arg0: i32) -> (i32, i32, i32) {
    %c0_i32 = arith.constant 0 : i32
    %c0_i32_0 = arith.constant 0 : i32
    %c0_i32_1 = arith.constant 0 : i32
    return %c0_i32, %arg0, %c0_i32_0 : i32, i32, i32
  }
  func.func @transform_1(%arg0: i32) -> (i32, i32) {
    %c0_i32 = arith.constant 0 : i32
    %c0_i32_0 = arith.constant 0 : i32
    %c0_i32_1 = arith.constant 0 : i32
    return %c0_i32, %c0_i32_0 : i32, i32
  }
  func.func @transform_2(%arg0: i32) -> (i32, i32) {
    %c0_i32 = arith.constant 0 : i32
    %c0_i32_0 = arith.constant 0 : i32
    %c0_i32_1 = arith.constant 0 : i32
    return %c0_i32, %c0_i32_0 : i32, i32
  }
  func.func @transform_3(%arg0: i32) -> (i32, i32) {
    %c0_i32 = arith.constant 0 : i32
    %c0_i32_0 = arith.constant 0 : i32
    %c0_i32_1 = arith.constant 0 : i32
    return %c0_i32, %c0_i32_0 : i32, i32
  }
  func.func @transform_4(%arg0: i32) -> (i32, i32) {
    %c0_i32 = arith.constant 0 : i32
    %c0_i32_0 = arith.constant 0 : i32
    %c0_i32_1 = arith.constant 0 : i32
    return %c0_i32, %c0_i32_0 : i32, i32
  }
  func.func @transform_5(%arg0: i32) -> (i32, i32) {
    %c0_i32 = arith.constant 0 : i32
    %c0_i32_0 = arith.constant 0 : i32
    %c0_i32_1 = arith.constant 0 : i32
    return %c0_i32, %c0_i32_0 : i32, i32
  }
  func.func @transform_6(%arg0: i32) -> (i32, i32) {
    %c0_i32 = arith.constant 0 : i32
    %c0_i32_0 = arith.constant 0 : i32
    %c0_i32_1 = arith.constant 0 : i32
    return %c0_i32, %c0_i32_0 : i32, i32
  }
  func.func @transform_7(%arg0: i32) -> (i32, i32) {
    %c0_i32 = arith.constant 0 : i32
    %c0_i32_0 = arith.constant 0 : i32
    %c0_i32_1 = arith.constant 0 : i32
    return %c0_i32, %c0_i32_0 : i32, i32
  }
  func.func @transform_8(%arg0: i32) -> (i32, i32) {
    %c0_i32 = arith.constant 0 : i32
    %c0_i32_0 = arith.constant 0 : i32
    %c0_i32_1 = arith.constant 0 : i32
    return %c0_i32, %c0_i32_0 : i32, i32
  }
  func.func @transform_9(%arg0: i32) -> (i32, i32) {
    %c0_i32 = arith.constant 0 : i32
    %c0_i32_0 = arith.constant 0 : i32
    %c0_i32_1 = arith.constant 0 : i32
    return %c0_i32, %c0_i32_0 : i32, i32
  }
  func.func @transform_10(%arg0: i32) -> (i32, i32) {
    %c0_i32 = arith.constant 0 : i32
    %c0_i32_0 = arith.constant 0 : i32
    %c0_i32_1 = arith.constant 0 : i32
    return %c0_i32, %c0_i32_0 : i32, i32
  }
  func.func @transform_11(%arg0: i32) -> (i32, i32) {
    %c0_i32 = arith.constant 0 : i32
    %c0_i32_0 = arith.constant 0 : i32
    return %arg0, %c0_i32 : i32, i32
  }
}

</mosaic_0001>

<bundles_post_ra>
// kernel: cnn_lstm_forward.1
= control target key start
LH: loop header
LB: loop body
LE: loop exit
PB: predicated region body
PF: predicated region fallthrough
CT: control target
= control target key end

     0   :  { %vm77_vm0 = vcmask 1043456   ;;  %vm52_vm1 = vcmask 97280   ;;  %s1586_s25 = smov 64   ;;  %vm172_vm6 = vcmask 261120   ;;  %s2134_s1 = inlined_call_operand.vmem [shape: f32[12,128], index: 1, kind: input, shape index: {}]   ;;  %s2135_s0 = inlined_call_operand.vmem [shape: f32[8,8,12], index: 0, kind: input, shape index: {}]   ;;  %s2136_s2 = inlined_call_operand.vmem [shape: f32[1,128], index: 2, kind: input, shape index: {}]   ;;  %s2137_s4 = inlined_call_operand.vmem [shape: f32[32,128], index: 4, kind: input, shape index: {}]   ;;  %s2138_s3 = inlined_call_operand.vmem [shape: f32[32,128], index: 3, kind: input, shape index: {}]   ;;  %s2139_s6 = inlined_call_operand.vmem [shape: f32[1,128], index: 6, kind: input, shape index: {}]   ;;  %s2140_s5 = inlined_call_operand.vmem [shape: f32[32,128], index: 5, kind: input, shape index: {}]   ;;  %s2141_s7 = inlined_call_operand.vmem [shape: f32[32,256], index: 7, kind: input, shape index: {}]   ;;  %s2142_s9 = inlined_call_operand.vmem [shape: f32[256,128], index: 9, kind: input, shape index: {}]   ;;  %s2143_s10 = inlined_call_operand.vmem [shape: f32[1,128], index: 10, kind: input, shape index: {}]   ;;  %s2144_s8 = inlined_call_operand.vmem [shape: f32[1,256], index: 8, kind: input, shape index: {}]   ;;  %s2145_s11 = inlined_call_operand.vmem [shape: f32[8,128], index: 11, kind: output, shape index: {}]  }
   0x1   :  { %v47_v0 = vld [vmem:[%s2134_s1 + $0x8] sm:$0xf]  ;;  %v46_v1 = vld [vmem:[%s2134_s1] sm:$0xff]  ;;  %s1585_s1 = smov 32   ;;  %v1669_v23 = vld [vmem:[%s2137_s4 + $0x18] sm:$0xff] }
   0x2   :  { %1399 = vmatpush.msk.msra.mxu0 %vm77_vm0, %v47_v0  ;;  %v38_v2 = vld [vmem:[%s2135_s0] sm:$0xff]  ;;  %v1674_v24 = vld [vmem:[%s2138_s3 + $0x18] sm:$0xff]  ;;  %v1679_v25 = vld [vmem:[%s2137_s4 + $0x10] sm:$0xff]  ;;  %187 = vmatpush.msra.mxu2 %v1669_v23 }
   0x3   :  { %v1660_v3 = vld [vmem:[%s2136_s2] ss:$0 sm:$0xff]  ;;  %263 = vmatpush.msra.mxu3 %v1674_v24  ;;  %v1686_v26 = vld [vmem:[%s2138_s3 + $0x10] sm:$0xff]  ;;  %v1691_v27 = vld [vmem:[%s2137_s4 + $0x8] sm:$0xff]  ;;  %480 = vmatpush.msra.mxu1 %v1669_v23 }
   0x4   :  { %96 = vmatpush.msra.mxu0 %v46_v1  ;;  %v1696_v28 = vld [vmem:[%s2138_s3 + $0x8] sm:$0xff]  ;;  %188 = vmatpush.msra.mxu2 %v1679_v25  ;;  %v1704_v29 = vld [vmem:[%s2137_s4] sm:$0xff] }
   0x5   :  { %1400 = vmatmul.msk.f32.vlgmr.msra.gmra.mxu0 %vm52_vm1, %v38_v2  ;;  %264 = vmatpush.msra.mxu3 %v1686_v26  ;;  %v1709_v30 = vld [vmem:[%s2138_s3] sm:$0xff]  ;;  %v39_v33 = vld [vmem:[%s2135_s0 + $0x8] sm:$0xff] }
   0x6   :  { %481 = vmatpush.msra.mxu1 %v1679_v25  ;;  %189 = vmatpush.msra.mxu2 %v1691_v27  ;;  %v1741_v37 = vld [vmem:[%s2139_s6] ss:$0 sm:$0xff] }
   0x7   :  { %265 = vmatpush.msra.mxu3 %v1696_v28 }
   0x8   :  { %482 = vmatpush.msra.mxu1 %v1691_v27  ;;  %190 = vmatpush.msra.mxu2 %v1704_v29 }
   0x9   :  { %266 = vmatpush.msra.mxu3 %v1709_v30 }
   0xa   :  { %483 = vmatpush.msra.mxu1 %v1704_v29 }
   0xb   :  { %330 = vmatpush.msrb.mxu3 %v1669_v23 }
   0xc   :  { %626 = vmatpush.msrb.mxu1 %v1669_v23 }
   0xd   :  { %331 = vmatpush.msrb.mxu3 %v1679_v25  ;;  %1401 = vmatmul.msk.f32.gmra.mxu0 %vm52_vm1, %v39_v33 }
   0xe   :  { %627 = vmatpush.msrb.mxu1 %v1679_v25 }
   0xf   :  { %332 = vmatpush.msrb.mxu3 %v1691_v27 }
  0x10   :  { %628 = vmatpush.msrb.mxu1 %v1691_v27 }
  0x11   :  { %333 = vmatpush.msrb.mxu3 %v1704_v29 }
  0x12   :  { %629 = vmatpush.msrb.mxu1 %v1704_v29 }
  0x82   :  { %v98_v4 = vpop.f32.mrf.mxu0 }
  0x83   :  { %v99_v5 = vadd.f32 %v1660_v3, %v98_v4 }
  0x85   :  { %1453 = vtanh.f32 %v99_v5  ;;  %v1408_v7 = vmul.f32 -1.442695, %v99_v5 }
  0x87   :  { %1455 = vpow2.f32 %v1408_v7 }
  0x8a   :  { %v101_v35 = vpop.f32.mrf.mxu0 }
  0x8b   :  { %v1454_v6 = vpop.eup %1453  ;;  %v102_v36 = vadd.f32 %v1660_v3, %v101_v35 }
  0x8c   :  { %156 = vrot.lane.b32.xlu0 %v1454_v6, %s1585_s1 }
  0x8d   :  { %v1456_v8 = vpop.eup %1455 }
  0x8e   :  { %v138_v9 = vadd.f32 1.0, %v1456_v8 }
  0x90   :  { %1457 = vrcp.f32 %v138_v9  ;;  %v150_v15 = vand.u32 2147483648, %v138_v9  ;;  %vm144_vm3 = vweird.f32 %v138_v9  ;;  %v148_v16 = vand.u32 2147483647, %v138_v9 }
  0x92   :  { %v151_v18 = vor.u32 1.1754944e-38, %v150_v15  ;;  %vm149_vm5 = vcmp.eq.f32.partialorder %v148_v16, 8.507059e+37  ;;  %v1762_v15 = vld [vmem:[%s2140_s5 + $0x8] sm:$0xff] }
  0x96   :  { %v1458_v10 = vpop.eup %1457 }
  0x97   :  { %v140_v11 = vmul.f32 %v1458_v10, %v138_v9  ;;  %vm145_vm2 = vweird.f32 %v1458_v10 }
  0x98   :  { %vm146_vm4 = vmor %vm144_vm3, %vm145_vm2 }
  0x99   :  { %v141_v12 = vsub.f32 1.0, %v140_v11 }
  0x9b   :  { %v142_v13 = vmul.f32 %v1458_v10, %v141_v12 }
  0x9d   :  { %v143_v14 = vadd.f32 %v1458_v10, %v142_v13  ;;  %v1751_v13 = vld [vmem:[%s2140_s5 + $0x18] sm:$0xff] }
  0x9e   :  { %243 = vmatpush.msrb.mxu2 %v1751_v13 }
  0x9f   :  { %v147_v17 = vsel %vm146_vm4, %v1458_v10, %v143_v14  ;;  %v1756_v14 = vld [vmem:[%s2140_s5 + $0x10] sm:$0xff] }
  0xa0   :  { %v152_v20 = vsel %vm149_vm5, %v151_v18, %v147_v17  ;;  %244 = vmatpush.msrb.mxu2 %v1756_v14  ;;  %v1768_v17 = vld [vmem:[%s2140_s5] sm:$0xff] }
  0xa2   :  { %245 = vmatpush.msrb.mxu2 %v1762_v15 }
  0xa4   :  { %246 = vmatpush.msrb.mxu2 %v1768_v17 }
  0xfe   :  { %v157_v19 = vpop.permute.xlu0 %156 }
  0xff   :  { %v159_v21 = vmul.f32 %v157_v19, %v152_v20 }
 0x101   :  { %1459 = vtanh.f32 %v159_v21  ;;  %293 = vrot.lane.b32.xlu2 %v159_v21, %s1585_s1 }
 0x107   :  { %v1460_v22 = vpop.eup %1459 }
 0x108   :  { %162 = vrot.lane.b32.xlu0 %v1460_v22, %s1586_s25 }
 0x15b   :  { %v294_v53 = vpop.permute.xlu2 %293 }
 0x17a   :  { %v163_v31 = vpop.permute.xlu0 %162 }
 0x17b   :  { %v165_v32 = vmul.f32 %v163_v31, %v152_v20 }
 0x17d   :  { %170 = vrot.lane.b32.xlu1 %v165_v32, %s1586_s25 }
 0x1ef   :  { %v171_v34 = vpop.permute.xlu1 %170 }
 0x1f0   :  { %1409 = vmatmul.msk.f32.vlgmr.msra.gmra.mxu2 %vm172_vm6, %v171_v34  ;;  %1412 = vmatmul.msk.f32.vlgmr.msra.gmra.mxu3 %vm172_vm6, %v171_v34  ;;  %v40_v34 = vld [vmem:[%s2135_s0 + $0x10] sm:$0xff] }
 0x1f1   :  { %417 = vmatpush.msra.mxu3 %v1674_v24  ;;  %397 = vmatpush.msra.mxu2 %v1751_v13 }
 0x1f2   :  { %1402 = vmatmul.msk.f32.gmra.mxu0 %vm52_vm1, %v40_v34 }
 0x1f3   :  { %418 = vmatpush.msra.mxu3 %v1686_v26  ;;  %398 = vmatpush.msra.mxu2 %v1756_v14 }
 0x1f5   :  { %419 = vmatpush.msra.mxu3 %v1696_v28  ;;  %399 = vmatpush.msra.mxu2 %v1762_v15 }
 0x1f7   :  { %420 = vmatpush.msra.mxu3 %v1709_v30  ;;  %400 = vmatpush.msra.mxu2 %v1768_v17 }
 0x273   :  { %v192_v38 = vpop.f32.mrf.mxu2  ;;  %v268_v39 = vpop.f32.mrf.mxu3 }
 0x274   :  { %v193_v40 = vadd.f32 %v1741_v37, %v192_v38  ;;  %v271_v41 = vadd.f32 %v268_v39, %v102_v36 }
 0x276   :  { %1461 = vtanh.f32 %v193_v40  ;;  %v1410_v44 = vmul.f32 -1.442695, %v193_v40  ;;  %v1413_v48 = vmul.f32 -1.442695, %v271_v41  ;;  %v104_v40 = vpop.f32.mrf.mxu0 }
 0x277   :  { %1463 = vtanh.f32 %v271_v41 }
 0x278   :  { %1465 = vpow2.f32 %v1410_v44 }
 0x27c   :  { %v1462_v42 = vpop.eup %1461 }
 0x27d   :  { %v1464_v43 = vpop.eup %1463  ;;  %216 = vrot.lane.b32.xlu2 %v1462_v42, %s1585_s1  ;;  %v105_v42 = vadd.f32 %v1660_v3, %v104_v40 }
 0x27e   :  { %298 = vrot.lane.b32.xlu1 %v1464_v43, %s1585_s1  ;;  %v1466_v45 = vpop.eup %1465 }
 0x27f   :  { %v198_v46 = vadd.f32 1.0, %v1466_v45 }
 0x281   :  { %1467 = vrcp.f32 %v198_v46  ;;  %v210_v56 = vand.u32 2147483648, %v198_v46  ;;  %vm204_vm8 = vweird.f32 %v198_v46  ;;  %v208_v57 = vand.u32 2147483647, %v198_v46 }
 0x282   :  { %1469 = vpow2.f32 %v1413_v48 }
 0x283   :  { %v211_v59 = vor.u32 1.1754944e-38, %v210_v56  ;;  %vm209_vm10 = vcmp.eq.f32.partialorder %v208_v57, 8.507059e+37 }
 0x287   :  { %v1468_v47 = vpop.eup %1467 }
 0x288   :  { %v200_v49 = vmul.f32 %v1468_v47, %v198_v46  ;;  %v1470_v52 = vpop.eup %1469  ;;  %vm205_vm7 = vweird.f32 %v1468_v47 }
 0x289   :  { %v275_v54 = vadd.f32 1.0, %v1470_v52  ;;  %vm206_vm9 = vmor %vm204_vm8, %vm205_vm7 }
 0x28a   :  { %v201_v50 = vsub.f32 1.0, %v200_v49 }
 0x28b   :  { %1471 = vrcp.f32 %v275_v54  ;;  %v287_v6 = vand.u32 2147483648, %v275_v54  ;;  %vm281_vm12 = vweird.f32 %v275_v54  ;;  %v285_v7 = vand.u32 2147483647, %v275_v54 }
 0x28c   :  { %v202_v51 = vmul.f32 %v1468_v47, %v201_v50 }
 0x28d   :  { %v288_v9 = vor.u32 1.1754944e-38, %v287_v6  ;;  %vm286_vm14 = vcmp.eq.f32.partialorder %v285_v7, 8.507059e+37 }
 0x28e   :  { %v203_v55 = vadd.f32 %v1468_v47, %v202_v51 }
 0x290   :  { %v207_v58 = vsel %vm206_vm9, %v1468_v47, %v203_v55 }
 0x291   :  { %v212_v61 = vsel %vm209_vm10, %v211_v59, %v207_v58  ;;  %v1472_v63 = vpop.eup %1471 }
 0x292   :  { %v277_v0 = vmul.f32 %v1472_v63, %v275_v54  ;;  %vm282_vm11 = vweird.f32 %v1472_v63 }
 0x293   :  { %vm283_vm13 = vmor %vm281_vm12, %vm282_vm11 }
 0x294   :  { %v278_v2 = vsub.f32 1.0, %v277_v0 }
 0x296   :  { %v279_v4 = vmul.f32 %v1472_v63, %v278_v2 }
 0x298   :  { %v280_v5 = vadd.f32 %v1472_v63, %v279_v4 }
 0x29a   :  { %v284_v8 = vsel %vm283_vm13, %v1472_v63, %v280_v5 }
 0x29b   :  { %v289_v11 = vsel %vm286_vm14, %v288_v9, %v284_v8 }
 0x29c   :  { %v296_v19 = vmul.f32 %v294_v53, %v289_v11 }
 0x2d7   :  { %v217_v60 = vpop.permute.xlu2 %216 }
 0x2d8   :  { %v219_v62 = vmul.f32 %v217_v60, %v212_v61 }
 0x2da   :  { %1473 = vtanh.f32 %v219_v62 }
 0x2e0   :  { %v1474_v1 = vpop.eup %1473 }
 0x2e1   :  { %222 = vrot.lane.b32.xlu1 %v1474_v1, %s1586_s25 }
 0x2f0   :  { %v299_v10 = vpop.permute.xlu1 %298 }
 0x2f1   :  { %v301_v12 = vmul.f32 %v299_v10, %v289_v11 }
 0x2f3   :  { %303 = vrot.lane.b32.xlu0 %v301_v12, %s1585_s1 }
 0x353   :  { %v223_v16 = vpop.permute.xlu1 %222 }
 0x354   :  { %v225_v18 = vmul.f32 %v223_v16, %v212_v61 }
 0x356   :  { %227 = vrot.lane.b32.xlu0 %v225_v18, %s1586_s25 }
 0x365   :  { %v304_v20 = vpop.permute.xlu0 %303 }
 0x366   :  { %v1777_v21 = vadd.f32 %v304_v20, %v296_v19 }
 0x368   :  { %1475 = vtanh.f32 %v1777_v21 }
 0x36e   :  { %v1476_v22 = vpop.eup %1475 }
 0x36f   :  { %309 = vrot.lane.b32.xlu2 %v1476_v22, %s1585_s1 }
 0x3c8   :  { %v228_v31 = vpop.permute.xlu0 %227 }
 0x3c9   :  { %v310_v32 = vpop.permute.xlu2 %309  ;;  %1411 = vmatmul.msk.f32.vlgmr.msrb.gmra.mxu2 %vm172_vm6, %v228_v31 }
 0x3ca   :  { %v312_v33 = vmul.f32 %v310_v32, %v289_v11  ;;  %543 = vmatpush.msrb.mxu2 %v1751_v13 }
 0x3cc   :  { %314 = vrot.lane.b32.xlu1 %v312_v33, %s1586_s25  ;;  %544 = vmatpush.msrb.mxu2 %v1756_v14 }
 0x3ce   :  { %545 = vmatpush.msrb.mxu2 %v1762_v15 }
 0x3d0   :  { %546 = vmatpush.msrb.mxu2 %v1768_v17 }
 0x3d4   :  { %360 = vrot.lane.b32.xlu1 %v219_v62, %s1585_s1 }
 0x43e   :  { %v315_v35 = vpop.permute.xlu1 %314 }
 0x43f   :  { %1414 = vmatmul.msk.f32.vlgmr.msrb.gmra.mxu3 %vm172_vm6, %v315_v35 }
 0x440   :  { %563 = vmatpush.msrb.mxu3 %v1674_v24 }
 0x442   :  { %564 = vmatpush.msrb.mxu3 %v1686_v26 }
 0x444   :  { %565 = vmatpush.msrb.mxu3 %v1696_v28 }
 0x446   :  { %566 = vmatpush.msrb.mxu3 %v1709_v30  ;;  %v361_v18 = vpop.permute.xlu1 %360 }
 0x447   :  { %1417 = vmatmul.msk.f32.vlgmr.msra.gmra.mxu3 %vm172_vm6, %v315_v35 }
 0x448   :  { %709 = vmatpush.msra.mxu3 %v1674_v24 }
 0x44a   :  { %710 = vmatpush.msra.mxu3 %v1686_v26 }
 0x44c   :  { %711 = vmatpush.msra.mxu3 %v1696_v28  ;;  %v248_v36 = vpop.f32.mrf.mxu2 }
 0x44e   :  { %712 = vmatpush.msra.mxu3 %v1709_v30 }
 0x4c2   :  { %v335_v38 = vpop.f32.mrf.mxu3 }
 0x4c3   :  { %v336_v39 = vadd.f32 %v335_v38, %v248_v36 }
 0x4c5   :  { %v338_v41 = vadd.f32 %v1741_v37, %v336_v39 }
 0x4c7   :  { %1477 = vtanh.f32 %v338_v41  ;;  %v1415_v47 = vmul.f32 -1.442695, %v338_v41 }
 0x4ca   :  { %v422_v43 = vpop.f32.mrf.mxu3 }
 0x4cb   :  { %v425_v44 = vadd.f32 %v422_v43, %v105_v42 }
 0x4cd   :  { %v1478_v45 = vpop.eup %1477  ;;  %1479 = vtanh.f32 %v425_v44  ;;  %v1418_v52 = vmul.f32 -1.442695, %v425_v44 }
 0x4ce   :  { %365 = vrot.lane.b32.xlu2 %v1478_v45, %s1585_s1  ;;  %1481 = vpow2.f32 %v1415_v47 }
 0x4d3   :  { %v1480_v46 = vpop.eup %1479 }
 0x4d4   :  { %448 = vrot.lane.b32.xlu0 %v1480_v46, %s1585_s1  ;;  %v1482_v48 = vpop.eup %1481 }
 0x4d5   :  { %v342_v49 = vadd.f32 1.0, %v1482_v48 }
 0x4d7   :  { %1483 = vrcp.f32 %v342_v49  ;;  %v354_v56 = vand.u32 2147483648, %v342_v49  ;;  %vm348_vm0 = vweird.f32 %v342_v49  ;;  %v352_v58 = vand.u32 2147483647, %v342_v49 }
 0x4d8   :  { %1485 = vpow2.f32 %v1418_v52 }
 0x4d9   :  { %v355_v61 = vor.u32 1.1754944e-38, %v354_v56  ;;  %vm353_vm3 = vcmp.eq.f32.partialorder %v352_v58, 8.507059e+37 }
 0x4dd   :  { %v1484_v50 = vpop.eup %1483 }
 0x4de   :  { %v344_v51 = vmul.f32 %v1484_v50, %v342_v49  ;;  %vm349_vm15 = vweird.f32 %v1484_v50  ;;  %v1486_v57 = vpop.eup %1485 }
 0x4df   :  { %vm350_vm2 = vmor %vm348_vm0, %vm349_vm15  ;;  %v429_v60 = vadd.f32 1.0, %v1486_v57 }
 0x4e0   :  { %v345_v53 = vsub.f32 1.0, %v344_v51 }
 0x4e1   :  { %1487 = vrcp.f32 %v429_v60  ;;  %v441_v7 = vand.u32 2147483648, %v429_v60  ;;  %vm435_vm5 = vweird.f32 %v429_v60  ;;  %v439_v8 = vand.u32 2147483647, %v429_v60 }
 0x4e2   :  { %v346_v54 = vmul.f32 %v1484_v50, %v345_v53 }
 0x4e3   :  { %v442_v10 = vor.u32 1.1754944e-38, %v441_v7  ;;  %vm440_vm8 = vcmp.eq.f32.partialorder %v439_v8, 8.507059e+37 }
 0x4e4   :  { %v347_v55 = vadd.f32 %v1484_v50, %v346_v54 }
 0x4e6   :  { %v351_v59 = vsel %vm350_vm2, %v1484_v50, %v347_v55 }
 0x4e7   :  { %v356_v63 = vsel %vm353_vm3, %v355_v61, %v351_v59  ;;  %v1488_v1 = vpop.eup %1487 }
 0x4e8   :  { %v431_v2 = vmul.f32 %v1488_v1, %v429_v60  ;;  %vm436_vm4 = vweird.f32 %v1488_v1  ;;  %v363_v19 = vmul.f32 %v361_v18, %v356_v63 }
 0x4e9   :  { %vm437_vm7 = vmor %vm435_vm5, %vm436_vm4 }
 0x4ea   :  { %v432_v4 = vsub.f32 1.0, %v431_v2 }
 0x4ec   :  { %v433_v5 = vmul.f32 %v1488_v1, %v432_v4 }
 0x4ee   :  { %v434_v6 = vadd.f32 %v1488_v1, %v433_v5 }
 0x4f0   :  { %v438_v9 = vsel %vm437_vm7, %v1488_v1, %v434_v6 }
 0x4f1   :  { %v443_v12 = vsel %vm440_vm8, %v442_v10, %v438_v9 }
 0x4f2   :  { %v446_v32 = vmul.f32 %v443_v12, %v1777_v21  ;;  %v41_v21 = vld [vmem:[%s2135_s0 + $0x18] sm:$0xff] }
 0x4f3   :  { %1403 = vmatmul.msk.f32.gmra.mxu0 %vm52_vm1, %v41_v21 }
 0x528   :  { %v366_v62 = vpop.permute.xlu2 %365 }
 0x529   :  { %v368_v0 = vmul.f32 %v366_v62, %v356_v63 }
 0x52b   :  { %370 = vrot.lane.b32.xlu2 %v368_v0, %s1585_s1 }
 0x546   :  { %v449_v11 = vpop.permute.xlu0 %448 }
 0x547   :  { %v451_v16 = vmul.f32 %v449_v11, %v443_v12 }
 0x549   :  { %453 = vrot.lane.b32.xlu0 %v451_v16, %s1585_s1 }
 0x570   :  { %v107_v43 = vpop.f32.mrf.mxu0 }
 0x571   :  { %v108_v48 = vadd.f32 %v1660_v3, %v107_v43 }
 0x585   :  { %v371_v20 = vpop.permute.xlu2 %370 }
 0x586   :  { %v1808_v22 = vadd.f32 %v371_v20, %v363_v19 }
 0x588   :  { %1489 = vtanh.f32 %v1808_v22 }
 0x58e   :  { %v1490_v31 = vpop.eup %1489 }
 0x58f   :  { %376 = vrot.lane.b32.xlu1 %v1490_v31, %s1585_s1 }
 0x5bb   :  { %v454_v33 = vpop.permute.xlu0 %453 }
 0x5bc   :  { %v1813_v34 = vadd.f32 %v454_v33, %v446_v32 }
 0x5be   :  { %1491 = vtanh.f32 %v1813_v34 }
 0x5c4   :  { %v1492_v35 = vpop.eup %1491 }
 0x5c5   :  { %459 = vrot.lane.b32.xlu2 %v1492_v35, %s1585_s1 }
 0x601   :  { %v377_v36 = vpop.permute.xlu1 %376 }
 0x602   :  { %v379_v38 = vmul.f32 %v377_v36, %v356_v63 }
 0x604   :  { %381 = vrot.lane.b32.xlu0 %v379_v38, %s1586_s25 }
 0x61f   :  { %v460_v39 = vpop.permute.xlu2 %459 }
 0x620   :  { %v462_v40 = vmul.f32 %v460_v39, %v443_v12 }
 0x622   :  { %464 = vrot.lane.b32.xlu1 %v462_v40, %s1586_s25 }
 0x676   :  { %v382_v41 = vpop.permute.xlu0 %381 }
 0x677   :  { %1416 = vmatmul.msk.f32.vlgmr.msra.gmra.mxu2 %vm172_vm6, %v382_v41 }
 0x678   :  { %689 = vmatpush.msra.mxu2 %v1751_v13 }
 0x67a   :  { %690 = vmatpush.msra.mxu2 %v1756_v14 }
 0x67c   :  { %691 = vmatpush.msra.mxu2 %v1762_v15 }
 0x67e   :  { %692 = vmatpush.msra.mxu2 %v1768_v17 }
 0x694   :  { %v465_v42 = vpop.permute.xlu1 %464 }
 0x695   :  { %1419 = vmatmul.msk.f32.vlgmr.msra.gmra.mxu1 %vm172_vm6, %v465_v42  ;;  %1422 = vmatmul.msk.f32.vlgmr.msrb.gmra.mxu3 %vm172_vm6, %v465_v42 }
 0x696   :  { %772 = vmatpush.msra.mxu1 %v1669_v23  ;;  %855 = vmatpush.msrb.mxu3 %v1674_v24 }
 0x698   :  { %773 = vmatpush.msra.mxu1 %v1679_v25  ;;  %856 = vmatpush.msrb.mxu3 %v1686_v26 }
 0x69a   :  { %774 = vmatpush.msra.mxu1 %v1691_v27  ;;  %857 = vmatpush.msrb.mxu3 %v1696_v28 }
 0x69c   :  { %775 = vmatpush.msra.mxu1 %v1704_v29  ;;  %858 = vmatpush.msrb.mxu3 %v1709_v30 }
 0x6fa   :  { %v402_v44 = vpop.f32.mrf.mxu2 }
 0x712   :  { %v485_v45 = vpop.f32.mrf.mxu1 }
 0x713   :  { %v486_v46 = vadd.f32 %v485_v45, %v402_v44 }
 0x715   :  { %v488_v47 = vadd.f32 %v1741_v37, %v486_v46 }
 0x717   :  { %1493 = vtanh.f32 %v488_v47  ;;  %v1420_v53 = vmul.f32 -1.442695, %v488_v47 }
 0x718   :  { %v568_v49 = vpop.f32.mrf.mxu3 }
 0x719   :  { %v571_v50 = vadd.f32 %v568_v49, %v108_v48 }
 0x71b   :  { %1495 = vtanh.f32 %v571_v50  ;;  %v1423_v58 = vmul.f32 -1.442695, %v571_v50 }
 0x71c   :  { %1497 = vpow2.f32 %v1420_v53 }
 0x71d   :  { %v1494_v51 = vpop.eup %1493 }
 0x71e   :  { %511 = vrot.lane.b32.xlu2 %v1494_v51, %s1585_s1 }
 0x721   :  { %v1496_v52 = vpop.eup %1495 }
 0x722   :  { %594 = vrot.lane.b32.xlu0 %v1496_v52, %s1585_s1  ;;  %v1498_v54 = vpop.eup %1497 }
 0x723   :  { %v492_v55 = vadd.f32 1.0, %v1498_v54 }
 0x725   :  { %1499 = vrcp.f32 %v492_v55  ;;  %v504_v63 = vand.u32 2147483648, %v492_v55  ;;  %vm498_vm10 = vweird.f32 %v492_v55  ;;  %v502_v0 = vand.u32 2147483647, %v492_v55 }
 0x726   :  { %1501 = vpow2.f32 %v1423_v58 }
 0x727   :  { %v505_v4 = vor.u32 1.1754944e-38, %v504_v63  ;;  %vm503_vm12 = vcmp.eq.f32.partialorder %v502_v0, 8.507059e+37 }
 0x72b   :  { %v1500_v56 = vpop.eup %1499 }
 0x72c   :  { %v494_v57 = vmul.f32 %v1500_v56, %v492_v55  ;;  %v1502_v61 = vpop.eup %1501  ;;  %vm499_vm9 = vweird.f32 %v1500_v56 }
 0x72d   :  { %v575_v1 = vadd.f32 1.0, %v1502_v61  ;;  %vm500_vm11 = vmor %vm498_vm10, %vm499_vm9 }
 0x72e   :  { %v495_v59 = vsub.f32 1.0, %v494_v57 }
 0x72f   :  { %1503 = vrcp.f32 %v575_v1  ;;  %v587_v16 = vand.u32 2147483648, %v575_v1  ;;  %vm581_vm14 = vweird.f32 %v575_v1  ;;  %v585_v18 = vand.u32 2147483647, %v575_v1 }
 0x730   :  { %v496_v60 = vmul.f32 %v1500_v56, %v495_v59 }
 0x731   :  { %v588_v20 = vor.u32 1.1754944e-38, %v587_v16  ;;  %vm586_vm0 = vcmp.eq.f32.partialorder %v585_v18, 8.507059e+37 }
 0x732   :  { %v497_v62 = vadd.f32 %v1500_v56, %v496_v60 }
 0x734   :  { %v501_v2 = vsel %vm500_vm11, %v1500_v56, %v497_v62 }
 0x735   :  { %v506_v6 = vsel %vm503_vm12, %v505_v4, %v501_v2  ;;  %v1504_v8 = vpop.eup %1503 }
 0x736   :  { %v577_v9 = vmul.f32 %v1504_v8, %v575_v1  ;;  %vm582_vm13 = vweird.f32 %v1504_v8  ;;  %v509_v35 = vmul.f32 %v506_v6, %v1808_v22 }
 0x737   :  { %vm583_vm15 = vmor %vm581_vm14, %vm582_vm13 }
 0x738   :  { %v578_v10 = vsub.f32 1.0, %v577_v9 }
 0x73a   :  { %v579_v11 = vmul.f32 %v1504_v8, %v578_v10 }
 0x73c   :  { %v580_v12 = vadd.f32 %v1504_v8, %v579_v11 }
 0x73e   :  { %v584_v19 = vsel %vm583_vm15, %v1504_v8, %v580_v12 }
 0x73f   :  { %v589_v32 = vsel %vm586_vm0, %v588_v20, %v584_v19 }
 0x740   :  { %v592_v39 = vmul.f32 %v589_v32, %v1813_v34  ;;  %v42_v34 = vld [vmem:[%s2135_s0 + $0x20] sm:$0xff] }
 0x741   :  { %1404 = vmatmul.msk.f32.gmra.mxu0 %vm52_vm1, %v42_v34 }
 0x778   :  { %v512_v5 = vpop.permute.xlu2 %511 }
 0x779   :  { %v514_v7 = vmul.f32 %v512_v5, %v506_v6 }
 0x77b   :  { %516 = vrot.lane.b32.xlu1 %v514_v7, %s1585_s1 }
 0x794   :  { %v595_v31 = vpop.permute.xlu0 %594 }
 0x795   :  { %v597_v33 = vmul.f32 %v595_v31, %v589_v32 }
 0x797   :  { %599 = vrot.lane.b32.xlu2 %v597_v33, %s1585_s1 }
 0x7be   :  { %v110_v48 = vpop.f32.mrf.mxu0 }
 0x7bf   :  { %v111_v53 = vadd.f32 %v1660_v3, %v110_v48 }
 0x7ed   :  { %v517_v36 = vpop.permute.xlu1 %516 }
 0x7ee   :  { %v1845_v38 = vadd.f32 %v517_v36, %v509_v35 }
 0x7f0   :  { %1505 = vtanh.f32 %v1845_v38 }
 0x7f1   :  { %v600_v40 = vpop.permute.xlu2 %599 }
 0x7f2   :  { %v1849_v21 = vadd.f32 %v600_v40, %v592_v39 }
 0x7f4   :  { %1507 = vtanh.f32 %v1849_v21 }
 0x7f6   :  { %v1506_v41 = vpop.eup %1505 }
 0x7f7   :  { %522 = vrot.lane.b32.xlu0 %v1506_v41, %s1585_s1 }
 0x7fa   :  { %v1508_v42 = vpop.eup %1507 }
 0x7fb   :  { %605 = vrot.lane.b32.xlu1 %v1508_v42, %s1585_s1 }
 0x869   :  { %v523_v43 = vpop.permute.xlu0 %522 }
 0x86a   :  { %v525_v22 = vmul.f32 %v523_v43, %v506_v6 }
 0x86c   :  { %527 = vrot.lane.b32.xlu2 %v525_v22, %s1586_s25 }
 0x86d   :  { %v606_v44 = vpop.permute.xlu1 %605 }
 0x86e   :  { %v608_v45 = vmul.f32 %v606_v44, %v589_v32 }
 0x870   :  { %610 = vrot.lane.b32.xlu0 %v608_v45, %s1586_s25 }
 0x8c6   :  { %v528_v46 = vpop.permute.xlu2 %527 }
 0x8c7   :  { %1421 = vmatmul.msk.f32.vlgmr.msrb.gmra.mxu2 %vm172_vm6, %v528_v46 }
 0x8c8   :  { %835 = vmatpush.msrb.mxu2 %v1751_v13 }
 0x8ca   :  { %836 = vmatpush.msrb.mxu2 %v1756_v14 }
 0x8cc   :  { %837 = vmatpush.msrb.mxu2 %v1762_v15 }
 0x8ce   :  { %838 = vmatpush.msrb.mxu2 %v1768_v17 }
 0x8e2   :  { %v611_v47 = vpop.permute.xlu0 %610 }
 0x8e3   :  { %1424 = vmatmul.msk.f32.vlgmr.msrb.gmra.mxu1 %vm172_vm6, %v611_v47  ;;  %1427 = vmatmul.msk.f32.vlgmr.msra.gmra.mxu3 %vm172_vm6, %v611_v47 }
 0x8e4   :  { %918 = vmatpush.msrb.mxu1 %v1669_v23  ;;  %1001 = vmatpush.msra.mxu3 %v1674_v24 }
 0x8e6   :  { %919 = vmatpush.msrb.mxu1 %v1679_v25  ;;  %1002 = vmatpush.msra.mxu3 %v1686_v26 }
 0x8e8   :  { %920 = vmatpush.msrb.mxu1 %v1691_v27  ;;  %1003 = vmatpush.msra.mxu3 %v1696_v28 }
 0x8ea   :  { %921 = vmatpush.msrb.mxu1 %v1704_v29  ;;  %1004 = vmatpush.msra.mxu3 %v1709_v30 }
 0x94a   :  { %v548_v49 = vpop.f32.mrf.mxu2 }
 0x960   :  { %v631_v50 = vpop.f32.mrf.mxu1 }
 0x961   :  { %v632_v51 = vadd.f32 %v631_v50, %v548_v49 }
 0x963   :  { %v634_v52 = vadd.f32 %v1741_v37, %v632_v51 }
 0x965   :  { %1509 = vtanh.f32 %v634_v52  ;;  %v1425_v61 = vmul.f32 -1.442695, %v634_v52 }
 0x966   :  { %v714_v54 = vpop.f32.mrf.mxu3 }
 0x967   :  { %v717_v55 = vadd.f32 %v714_v54, %v111_v53 }
 0x969   :  { %1511 = vtanh.f32 %v717_v55  ;;  %v1428_v58 = vmul.f32 -1.442695, %v717_v55 }
 0x96b   :  { %v1510_v56 = vpop.eup %1509  ;;  %1513 = vpow2.f32 %v1428_v58 }
 0x96c   :  { %657 = vrot.lane.b32.xlu1 %v1510_v56, %s1585_s1 }
 0x96f   :  { %v1512_v57 = vpop.eup %1511 }
 0x970   :  { %740 = vrot.lane.b32.xlu2 %v1512_v57, %s1585_s1 }
 0x971   :  { %v1514_v59 = vpop.eup %1513 }
 0x972   :  { %v721_v60 = vadd.f32 1.0, %v1514_v59 }
 0x974   :  { %1515 = vrcp.f32 %v721_v60  ;;  %v733_v6 = vand.u32 2147483648, %v721_v60  ;;  %vm727_vm3 = vweird.f32 %v721_v60  ;;  %v731_v7 = vand.u32 2147483647, %v721_v60 }
 0x975   :  { %1517 = vpow2.f32 %v1425_v61 }
 0x976   :  { %v734_v10 = vor.u32 1.1754944e-38, %v733_v6  ;;  %vm732_vm5 = vcmp.eq.f32.partialorder %v731_v7, 8.507059e+37 }
 0x97a   :  { %v1516_v62 = vpop.eup %1515 }
 0x97b   :  { %v723_v63 = vmul.f32 %v1516_v62, %v721_v60  ;;  %v1518_v0 = vpop.eup %1517  ;;  %vm728_vm2 = vweird.f32 %v1516_v62 }
 0x97c   :  { %v638_v2 = vadd.f32 1.0, %v1518_v0  ;;  %vm729_vm4 = vmor %vm727_vm3, %vm728_vm2 }
 0x97d   :  { %v724_v1 = vsub.f32 1.0, %v723_v63 }
 0x97e   :  { %1519 = vrcp.f32 %v638_v2  ;;  %v650_v32 = vand.u32 2147483648, %v638_v2  ;;  %vm644_vm8 = vweird.f32 %v638_v2  ;;  %v648_v33 = vand.u32 2147483647, %v638_v2 }
 0x97f   :  { %v725_v4 = vmul.f32 %v1516_v62, %v724_v1 }
 0x980   :  { %v651_v36 = vor.u32 1.1754944e-38, %v650_v32  ;;  %vm649_vm10 = vcmp.eq.f32.partialorder %v648_v33, 8.507059e+37 }
 0x981   :  { %v726_v5 = vadd.f32 %v1516_v62, %v725_v4 }
 0x983   :  { %v730_v8 = vsel %vm729_vm4, %v1516_v62, %v726_v5 }
 0x984   :  { %v1520_v9 = vpop.eup %1519  ;;  %v735_v12 = vsel %vm732_vm5, %v734_v10, %v730_v8 }
 0x985   :  { %v640_v18 = vmul.f32 %v1520_v9, %v638_v2  ;;  %vm645_vm7 = vweird.f32 %v1520_v9  ;;  %v738_v42 = vmul.f32 %v735_v12, %v1849_v21 }
 0x986   :  { %vm646_vm9 = vmor %vm644_vm8, %vm645_vm7 }
 0x987   :  { %v641_v19 = vsub.f32 1.0, %v640_v18 }
 0x989   :  { %v642_v20 = vmul.f32 %v1520_v9, %v641_v19 }
 0x98b   :  { %v643_v31 = vadd.f32 %v1520_v9, %v642_v20 }
 0x98d   :  { %v647_v35 = vsel %vm646_vm9, %v1520_v9, %v643_v31 }
 0x98e   :  { %v652_v40 = vsel %vm649_vm10, %v651_v36, %v647_v35 }
 0x98f   :  { %v655_v45 = vmul.f32 %v652_v40, %v1845_v38  ;;  %v43_v38 = vld [vmem:[%s2135_s0 + $0x28] sm:$0xff] }
 0x990   :  { %1405 = vmatmul.msk.f32.gmra.mxu0 %vm52_vm1, %v43_v38  ;;  %v1581_v38 = vld [vmem:[%s2137_s4 + $0x18] sm:$0xff] }
 0x9ca   :  { %v741_v11 = vpop.permute.xlu2 %740 }
 0x9cb   :  { %v743_v16 = vmul.f32 %v741_v11, %v735_v12 }
 0x9cd   :  { %745 = vrot.lane.b32.xlu1 %v743_v16, %s1585_s1 }
 0x9de   :  { %v658_v39 = vpop.permute.xlu1 %657 }
 0x9df   :  { %v660_v41 = vmul.f32 %v658_v39, %v652_v40 }
 0x9e1   :  { %662 = vrot.lane.b32.xlu0 %v660_v41, %s1585_s1 }
 0xa3f   :  { %v746_v43 = vpop.permute.xlu1 %745 }
 0xa40   :  { %v1882_v22 = vadd.f32 %v746_v43, %v738_v42 }
 0xa42   :  { %1521 = vtanh.f32 %v1882_v22 }
 0xa48   :  { %v1522_v44 = vpop.eup %1521 }
 0xa49   :  { %751 = vrot.lane.b32.xlu0 %v1522_v44, %s1585_s1 }
 0xa53   :  { %v663_v34 = vpop.permute.xlu0 %662 }
 0xa54   :  { %v1887_v46 = vadd.f32 %v663_v34, %v655_v45 }
 0xa56   :  { %1523 = vtanh.f32 %v1887_v46 }
 0xa5c   :  { %v1524_v47 = vpop.eup %1523 }
 0xa5d   :  { %668 = vrot.lane.b32.xlu2 %v1524_v47, %s1585_s1 }
 0xab7   :  { %v669_v48 = vpop.permute.xlu2 %668 }
 0xab8   :  { %v671_v21 = vmul.f32 %v669_v48, %v652_v40 }
 0xaba   :  { %673 = vrot.lane.b32.xlu1 %v671_v21, %s1586_s25 }
 0xabb   :  { %v752_v49 = vpop.permute.xlu0 %751 }
 0xabc   :  { %v754_v50 = vmul.f32 %v752_v49, %v735_v12 }
 0xabe   :  { %756 = vrot.lane.b32.xlu2 %v754_v50, %s1586_s25 }
 0xb18   :  { %v757_v51 = vpop.permute.xlu2 %756 }
 0xb19   :  { %1429 = vmatmul.msk.f32.vlgmr.msra.gmra.mxu1 %vm172_vm6, %v757_v51  ;;  %1432 = vmatmul.msk.f32.vlgmr.msrb.gmra.mxu3 %vm172_vm6, %v757_v51  ;;  %v1582_v51 = vld [vmem:[%s2137_s4 + $0x10] sm:$0xff] }
 0xb1a   :  { %1064 = vmatpush.msra.mxu1 %v1669_v23  ;;  %1147 = vmatpush.msrb.mxu3 %v1674_v24  ;;  %v113_v23 = vpop.f32.mrf.mxu0 }
 0xb1b   :  { %v114_v24 = vadd.f32 %v1660_v3, %v113_v23 }
 0xb1c   :  { %1065 = vmatpush.msra.mxu1 %v1679_v25  ;;  %1148 = vmatpush.msrb.mxu3 %v1686_v26 }
 0xb1e   :  { %1066 = vmatpush.msra.mxu1 %v1691_v27  ;;  %1149 = vmatpush.msrb.mxu3 %v1696_v28 }
 0xb20   :  { %1067 = vmatpush.msra.mxu1 %v1704_v29  ;;  %1150 = vmatpush.msrb.mxu3 %v1709_v30 }
 0xb2c   :  { %v674_v52 = vpop.permute.xlu1 %673 }
 0xb2d   :  { %1426 = vmatmul.msk.f32.vlgmr.msra.gmra.mxu2 %vm172_vm6, %v674_v52 }
 0xb2e   :  { %981 = vmatpush.msra.mxu2 %v1751_v13 }
 0xb30   :  { %982 = vmatpush.msra.mxu2 %v1756_v14 }
 0xb32   :  { %983 = vmatpush.msra.mxu2 %v1762_v15 }
 0xb34   :  { %984 = vmatpush.msra.mxu2 %v1768_v17 }
 0xb96   :  { %v777_v30 = vpop.f32.mrf.mxu1 }
 0xb9c   :  { %v860_v25 = vpop.f32.mrf.mxu3 }
 0xb9d   :  { %v863_v26 = vadd.f32 %v860_v25, %v114_v24  ;;  %v1952_v24 = vld [vmem:[%s2136_s2] ss:$0 sm:$0xff] }
 0xb9f   :  { %1525 = vtanh.f32 %v863_v26  ;;  %v1433_v57 = vmul.f32 -1.442695, %v863_v26 }
 0xba5   :  { %v1526_v28 = vpop.eup %1525 }
 0xba6   :  { %886 = vrot.lane.b32.xlu1 %v1526_v28, %s1585_s1 }
 0xbb0   :  { %v694_v53 = vpop.f32.mrf.mxu2 }
 0xbb1   :  { %v778_v54 = vadd.f32 %v777_v30, %v694_v53 }
 0xbb3   :  { %v780_v55 = vadd.f32 %v1741_v37, %v778_v54 }
 0xbb5   :  { %1527 = vtanh.f32 %v780_v55  ;;  %v1430_v3 = vmul.f32 -1.442695, %v780_v55 }
 0xbb6   :  { %1529 = vpow2.f32 %v1433_v57 }
 0xbbb   :  { %v1528_v56 = vpop.eup %1527 }
 0xbbc   :  { %803 = vrot.lane.b32.xlu0 %v1528_v56, %s1585_s1  ;;  %v1530_v58 = vpop.eup %1529 }
 0xbbd   :  { %v867_v59 = vadd.f32 1.0, %v1530_v58 }
 0xbbf   :  { %1531 = vrcp.f32 %v867_v59  ;;  %v879_v4 = vand.u32 2147483648, %v867_v59  ;;  %vm873_vm12 = vweird.f32 %v867_v59  ;;  %v877_v5 = vand.u32 2147483647, %v867_v59 }
 0xbc0   :  { %1533 = vpow2.f32 %v1430_v3 }
 0xbc1   :  { %v880_v7 = vor.u32 1.1754944e-38, %v879_v4  ;;  %vm878_vm14 = vcmp.eq.f32.partialorder %v877_v5, 8.507059e+37 }
 0xbc5   :  { %v1532_v60 = vpop.eup %1531 }
 0xbc6   :  { %v869_v61 = vmul.f32 %v1532_v60, %v867_v59  ;;  %v1534_v63 = vpop.eup %1533  ;;  %vm874_vm11 = vweird.f32 %v1532_v60 }
 0xbc7   :  { %v784_v1 = vadd.f32 1.0, %v1534_v63  ;;  %vm875_vm13 = vmor %vm873_vm12, %vm874_vm11 }
 0xbc8   :  { %v870_v62 = vsub.f32 1.0, %v869_v61 }
 0xbc9   :  { %1535 = vrcp.f32 %v784_v1  ;;  %v796_v20 = vand.u32 2147483648, %v784_v1  ;;  %vm790_vm0 = vweird.f32 %v784_v1  ;;  %v794_v31 = vand.u32 2147483647, %v784_v1 }
 0xbca   :  { %v871_v0 = vmul.f32 %v1532_v60, %v870_v62 }
 0xbcb   :  { %v797_v33 = vor.u32 1.1754944e-38, %v796_v20  ;;  %vm795_vm3 = vcmp.eq.f32.partialorder %v794_v31, 8.507059e+37 }
 0xbcc   :  { %v872_v2 = vadd.f32 %v1532_v60, %v871_v0 }
 0xbce   :  { %v876_v6 = vsel %vm875_vm13, %v1532_v60, %v872_v2 }
 0xbcf   :  { %v1536_v8 = vpop.eup %1535  ;;  %v881_v10 = vsel %vm878_vm14, %v880_v7, %v876_v6 }
 0xbd0   :  { %v786_v12 = vmul.f32 %v1536_v8, %v784_v1  ;;  %vm791_vm15 = vweird.f32 %v1536_v8  ;;  %v884_v43 = vmul.f32 %v881_v10, %v1882_v22  ;;  %v44_v22 = vld [vmem:[%s2135_s0 + $0x30] sm:$0xff] }
 0xbd1   :  { %vm792_vm2 = vmor %vm790_vm0, %vm791_vm15  ;;  %1406 = vmatmul.msk.f32.gmra.mxu0 %vm52_vm1, %v44_v22 }
 0xbd2   :  { %v787_v16 = vsub.f32 1.0, %v786_v12 }
 0xbd4   :  { %v788_v18 = vmul.f32 %v1536_v8, %v787_v16 }
 0xbd6   :  { %v789_v19 = vadd.f32 %v1536_v8, %v788_v18 }
 0xbd8   :  { %v793_v32 = vsel %vm792_vm2, %v1536_v8, %v789_v19 }
 0xbd9   :  { %v798_v36 = vsel %vm795_vm3, %v797_v33, %v793_v32 }
 0xbda   :  { %v801_v40 = vmul.f32 %v798_v36, %v1887_v46 }
 0xc18   :  { %v887_v9 = vpop.permute.xlu1 %886 }
 0xc19   :  { %v889_v11 = vmul.f32 %v887_v9, %v881_v10 }
 0xc1b   :  { %891 = vrot.lane.b32.xlu0 %v889_v11, %s1585_s1 }
 0xc2e   :  { %v804_v35 = vpop.permute.xlu0 %803 }
 0xc2f   :  { %v806_v39 = vmul.f32 %v804_v35, %v798_v36 }
 0xc31   :  { %808 = vrot.lane.b32.xlu2 %v806_v39, %s1585_s1 }
 0xc4e   :  { %v116_v23 = vpop.f32.mrf.mxu0 }
 0xc8b   :  { %v809_v41 = vpop.permute.xlu2 %808 }
 0xc8c   :  { %v1919_v42 = vadd.f32 %v809_v41, %v801_v40 }
 0xc8d   :  { %v892_v44 = vpop.permute.xlu0 %891 }
 0xc8e   :  { %1537 = vtanh.f32 %v1919_v42  ;;  %v1923_v45 = vadd.f32 %v892_v44, %v884_v43 }
 0xc90   :  { %1539 = vtanh.f32 %v1923_v45 }
 0xc94   :  { %v1538_v34 = vpop.eup %1537 }
 0xc95   :  { %814 = vrot.lane.b32.xlu1 %v1538_v34, %s1585_s1 }
 0xc96   :  { %v1540_v47 = vpop.eup %1539 }
 0xc97   :  { %897 = vrot.lane.b32.xlu2 %v1540_v47, %s1585_s1 }
 0xcf1   :  { %v898_v48 = vpop.permute.xlu2 %897 }
 0xcf2   :  { %v900_v46 = vmul.f32 %v898_v48, %v881_v10 }
 0xcf4   :  { %902 = vrot.lane.b32.xlu1 %v900_v46, %s1586_s25 }
 0xd07   :  { %v815_v21 = vpop.permute.xlu1 %814 }
 0xd08   :  { %v817_v49 = vmul.f32 %v815_v21, %v798_v36 }
 0xd0a   :  { %819 = vrot.lane.b32.xlu0 %v817_v49, %s1586_s25 }
 0xd66   :  { %v903_v50 = vpop.permute.xlu1 %902 }
 0xd67   :  { %1434 = vmatmul.msk.f32.vlgmr.msrb.gmra.mxu1 %vm172_vm6, %v903_v50  ;;  %1437 = vmatmul.msk.f32.vlgmr.msra.gmra.mxu3 %vm172_vm6, %v903_v50 }
 0xd68   :  { %1210 = vmatpush.msrb.mxu1 %v1581_v38 }
 0xd6a   :  { %1211 = vmatpush.msrb.mxu1 %v1582_v51 }
 0xd6c   :  { %1212 = vmatpush.msrb.mxu1 %v1691_v27  ;;  %v117_v27 = vadd.f32 %v1952_v24, %v116_v23 }
 0xd6e   :  { %1213 = vmatpush.msrb.mxu1 %v1704_v29 }
 0xd7c   :  { %v820_v52 = vpop.permute.xlu0 %819 }
 0xd7d   :  { %1431 = vmatmul.msk.f32.vlgmr.msrb.gmra.mxu2 %vm172_vm6, %v820_v52  ;;  %v1983_v52 = vld [vmem:[%s2139_s6] ss:$0 sm:$0xff] }
 0xd7e   :  { %1127 = vmatpush.msrb.mxu2 %v1751_v13 }
 0xd80   :  { %1128 = vmatpush.msrb.mxu2 %v1756_v14 }
 0xd82   :  { %1129 = vmatpush.msrb.mxu2 %v1762_v15 }
 0xd84   :  { %1130 = vmatpush.msrb.mxu2 %v1768_v17 }
 0xde4   :  { %v923_v13 = vpop.f32.mrf.mxu1 }
 0xdea   :  { %v1006_v29 = vpop.f32.mrf.mxu3 }
 0xdeb   :  { %v1009_v25 = vadd.f32 %v1006_v29, %v117_v27 }
 0xded   :  { %1541 = vtanh.f32 %v1009_v25  ;;  %v1438_v30 = vmul.f32 -1.442695, %v1009_v25 }
 0xdf3   :  { %v1542_v26 = vpop.eup %1541 }
 0xdf4   :  { %1032 = vrot.lane.b32.xlu0 %v1542_v26, %s1585_s1 }
 0xe00   :  { %v840_v14 = vpop.f32.mrf.mxu2 }
 0xe01   :  { %v924_v28 = vadd.f32 %v923_v13, %v840_v14 }
 0xe03   :  { %v926_v15 = vadd.f32 %v1741_v37, %v924_v28 }
 0xe05   :  { %1543 = vtanh.f32 %v926_v15  ;;  %v1435_v53 = vmul.f32 -1.442695, %v926_v15 }
 0xe06   :  { %1545 = vpow2.f32 %v1438_v30 }
 0xe07   :  { %1547 = vpow2.f32 %v1435_v53 }
 0xe0b   :  { %v1544_v17 = vpop.eup %1543 }
 0xe0c   :  { %949 = vrot.lane.b32.xlu2 %v1544_v17, %s1585_s1  ;;  %v1546_v54 = vpop.eup %1545 }
 0xe0d   :  { %v1548_v55 = vpop.eup %1547  ;;  %v1013_v56 = vadd.f32 1.0, %v1546_v54 }
 0xe0e   :  { %v930_v57 = vadd.f32 1.0, %v1548_v55 }
 0xe0f   :  { %1549 = vrcp.f32 %v1013_v56  ;;  %vm1019_vm7 = vweird.f32 %v1013_v56  ;;  %v1025_v2 = vand.u32 2147483648, %v1013_v56  ;;  %v1023_v5 = vand.u32 2147483647, %v1013_v56 }
 0xe10   :  { %1551 = vrcp.f32 %v930_v57  ;;  %v942_v4 = vand.u32 2147483648, %v930_v57  ;;  %vm936_vm9 = vweird.f32 %v930_v57  ;;  %v940_v6 = vand.u32 2147483647, %v930_v57 }
 0xe11   :  { %v1026_v9 = vor.u32 1.1754944e-38, %v1025_v2  ;;  %vm1024_vm11 = vcmp.eq.f32.partialorder %v1023_v5, 8.507059e+37 }
 0xe12   :  { %v943_v10 = vor.u32 1.1754944e-38, %v942_v4  ;;  %vm941_vm12 = vcmp.eq.f32.partialorder %v940_v6, 8.507059e+37 }
 0xe15   :  { %v1550_v58 = vpop.eup %1549 }
 0xe16   :  { %v1552_v59 = vpop.eup %1551  ;;  %v1015_v3 = vmul.f32 %v1550_v58, %v1013_v56  ;;  %vm1020_vm4 = vweird.f32 %v1550_v58 }
 0xe17   :  { %v932_v60 = vmul.f32 %v1552_v59, %v930_v57  ;;  %vm937_vm5 = vweird.f32 %v1552_v59  ;;  %vm1021_vm8 = vmor %vm1019_vm7, %vm1020_vm4 }
 0xe18   :  { %v1016_v61 = vsub.f32 1.0, %v1015_v3  ;;  %vm938_vm10 = vmor %vm936_vm9, %vm937_vm5 }
 0xe19   :  { %v933_v37 = vsub.f32 1.0, %v932_v60 }
 0xe1a   :  { %v1017_v62 = vmul.f32 %v1550_v58, %v1016_v61 }
 0xe1b   :  { %v934_v63 = vmul.f32 %v1552_v59, %v933_v37 }
 0xe1c   :  { %v1018_v0 = vadd.f32 %v1550_v58, %v1017_v62 }
 0xe1d   :  { %v935_v1 = vadd.f32 %v1552_v59, %v934_v63 }
 0xe1e   :  { %v1022_v7 = vsel %vm1021_vm8, %v1550_v58, %v1018_v0 }
 0xe1f   :  { %v939_v8 = vsel %vm938_vm10, %v1552_v59, %v935_v1  ;;  %v1027_v12 = vsel %vm1024_vm11, %v1026_v9, %v1022_v7 }
 0xe20   :  { %v944_v18 = vsel %vm941_vm12, %v943_v10, %v939_v8  ;;  %v1030_v31 = vmul.f32 %v1027_v12, %v1923_v45 }
 0xe21   :  { %v947_v36 = vmul.f32 %v944_v18, %v1919_v42  ;;  %v45_v42 = vld [vmem:[%s2135_s0 + $0x38] sm:$0xff] }
 0xe22   :  { %1407 = vmatmul.msk.f32.gmra.mxu0 %vm52_vm1, %v45_v42 }
 0xe66   :  { %v1033_v11 = vpop.permute.xlu0 %1032  ;;  %v950_v16 = vpop.permute.xlu2 %949 }
 0xe67   :  { %v1035_v19 = vmul.f32 %v1033_v11, %v1027_v12  ;;  %v952_v20 = vmul.f32 %v950_v16, %v944_v18 }
 0xe69   :  { %1037 = vrot.lane.b32.xlu2 %v1035_v19, %s1585_s1  ;;  %954 = vrot.lane.b32.xlu1 %v952_v20, %s1585_s1 }
 0xe9f   :  { %v119_v46 = vpop.f32.mrf.mxu0 }
 0xea0   :  { %v120_v21 = vadd.f32 %v1952_v24, %v119_v46 }
 0xec3   :  { %v1038_v32 = vpop.permute.xlu2 %1037 }
 0xec4   :  { %v1961_v33 = vadd.f32 %v1038_v32, %v1030_v31 }
 0xec6   :  { %1553 = vtanh.f32 %v1961_v33 }
 0xecc   :  { %v1554_v35 = vpop.eup %1553 }
 0xecd   :  { %1043 = vrot.lane.b32.xlu1 %v1554_v35, %s1585_s1 }
 0xedb   :  { %v955_v39 = vpop.permute.xlu1 %954 }
 0xedc   :  { %v1966_v40 = vadd.f32 %v955_v39, %v947_v36 }
 0xede   :  { %1555 = vtanh.f32 %v1966_v40 }
 0xee4   :  { %v1556_v41 = vpop.eup %1555 }
 0xee5   :  { %960 = vrot.lane.b32.xlu0 %v1556_v41, %s1585_s1 }
 0xf3f   :  { %v1044_v43 = vpop.permute.xlu1 %1043 }
 0xf40   :  { %v1046_v44 = vmul.f32 %v1044_v43, %v1027_v12 }
 0xf42   :  { %1048 = vrot.lane.b32.xlu0 %v1046_v44, %s1586_s25 }
 0xf57   :  { %v961_v45 = vpop.permute.xlu0 %960 }
 0xf58   :  { %v963_v34 = vmul.f32 %v961_v45, %v944_v18 }
 0xf5a   :  { %965 = vrot.lane.b32.xlu2 %v963_v34, %s1586_s25 }
 0xfb4   :  { %v966_v47 = vpop.permute.xlu2 %965  ;;  %v1049_v48 = vpop.permute.xlu0 %1048 }
 0xfb5   :  { %1436 = vmatmul.msk.f32.vlgmr.msra.gmra.mxu2 %vm172_vm6, %v966_v47  ;;  %1439 = vmatmul.msk.f32.vlgmr.msra.gmra.mxu1 %vm172_vm6, %v1049_v48 }
 0xfb6   :  { %1442 = vmatmul.msk.f32.vlgmr.msrb.gmra.mxu3 %vm172_vm6, %v1049_v48 }
0x1032   :  { %v1069_v49 = vpop.f32.mrf.mxu1 }
0x1038   :  { %v986_v22 = vpop.f32.mrf.mxu2 }
0x1039   :  { %v1070_v50 = vadd.f32 %v1069_v49, %v986_v22  ;;  %v1152_v38 = vpop.f32.mrf.mxu3 }
0x103a   :  { %v1155_v51 = vadd.f32 %v1152_v38, %v120_v21 }
0x103b   :  { %v1072_v23 = vadd.f32 %v1983_v52, %v1070_v50 }
0x103c   :  { %1557 = vtanh.f32 %v1155_v51  ;;  %v1443_v24 = vmul.f32 -1.442695, %v1155_v51 }
0x103d   :  { %1559 = vtanh.f32 %v1072_v23  ;;  %v1440_v14 = vmul.f32 -1.442695, %v1072_v23 }
0x103e   :  { %1561 = vpow2.f32 %v1443_v24 }
0x1042   :  { %v1558_v27 = vpop.eup %1557 }
0x1043   :  { %v1560_v29 = vpop.eup %1559  ;;  %1178 = vrot.lane.b32.xlu2 %v1558_v27, %s1585_s1 }
0x1044   :  { %1095 = vrot.lane.b32.xlu1 %v1560_v29, %s1585_s1  ;;  %v1562_v25 = vpop.eup %1561 }
0x1045   :  { %v1159_v26 = vadd.f32 1.0, %v1562_v25 }
0x1047   :  { %1563 = vrcp.f32 %v1159_v26  ;;  %v1171_v55 = vand.u32 2147483648, %v1159_v26  ;;  %vm1165_vm13 = vweird.f32 %v1159_v26  ;;  %v1169_v56 = vand.u32 2147483647, %v1159_v26 }
0x1048   :  { %1565 = vpow2.f32 %v1440_v14  ;;  %v1262_v14 = vld [vmem:[%s2141_s7 + $0x30] sm:$0xff] }
0x1049   :  { %v1172_v58 = vor.u32 1.1754944e-38, %v1171_v55  ;;  %vm1170_vm15 = vcmp.eq.f32.partialorder %v1169_v56, 8.507059e+37  ;;  %1287 = vmatpush.msra.mxu2 %v1262_v14  ;;  %v1257_v55 = vld [vmem:[%s2141_s7 + $0x8] sm:$0xff] }
0x104d   :  { %v1564_v13 = vpop.eup %1563 }
0x104e   :  { %v1161_v28 = vmul.f32 %v1564_v13, %v1159_v26  ;;  %v1566_v30 = vpop.eup %1565  ;;  %vm1166_vm1 = vweird.f32 %v1564_v13 }
0x104f   :  { %v1076_v53 = vadd.f32 1.0, %v1566_v30  ;;  %vm1167_vm14 = vmor %vm1165_vm13, %vm1166_vm1  ;;  %v1258_v30 = vld [vmem:[%s2141_s7 + $0x10] sm:$0xff] }
0x1050   :  { %v1162_v15 = vsub.f32 1.0, %v1161_v28  ;;  %v1263_v28 = vld [vmem:[%s2141_s7 + $0x38] sm:$0xff] }
0x1051   :  { %1567 = vrcp.f32 %v1076_v53  ;;  %v1088_v1 = vand.u32 2147483648, %v1076_v53  ;;  %vm1082_vm2 = vweird.f32 %v1076_v53  ;;  %v1086_v2 = vand.u32 2147483647, %v1076_v53  ;;  %1307 = vmatpush.msra.mxu3 %v1263_v28 }
0x1052   :  { %v1163_v17 = vmul.f32 %v1564_v13, %v1162_v15  ;;  %v1260_v15 = vld [vmem:[%s2141_s7 + $0x20] sm:$0xff] }
0x1053   :  { %v1089_v5 = vor.u32 1.1754944e-38, %v1088_v1  ;;  %vm1087_vm4 = vcmp.eq.f32.partialorder %v1086_v2, 8.507059e+37  ;;  %1288 = vmatpush.msra.mxu2 %v1260_v15  ;;  %v1327_v1 = vld [vmem:[%s2142_s9 + $0x50] sm:$0xff]  ;;  %v1344_v2 = vld [vmem:[%s2142_s9 + $0xd8] sm:$0xff] }
0x1054   :  { %v1164_v54 = vadd.f32 %v1564_v13, %v1163_v17  ;;  %v1261_v17 = vld [vmem:[%s2141_s7 + $0x28] sm:$0xff] }
0x1055   :  { %1308 = vmatpush.msra.mxu3 %v1261_v17  ;;  %1289 = vmatpush.msra.mxu2 %v1258_v30 }
0x1056   :  { %v1168_v57 = vsel %vm1167_vm14, %v1564_v13, %v1164_v54  ;;  %v1256_v54 = vld [vmem:[%s2141_s7] sm:$0xff] }
0x1057   :  { %v1173_v3 = vsel %vm1170_vm15, %v1172_v58, %v1168_v57  ;;  %v1568_v61 = vpop.eup %1567  ;;  %1290 = vmatpush.msra.mxu2 %v1256_v54  ;;  %v1332_v58 = vld [vmem:[%s2142_s9 + $0x78] sm:$0xff] }
0x1058   :  { %v1078_v37 = vmul.f32 %v1568_v61, %v1076_v53  ;;  %vm1083_vm0 = vweird.f32 %v1568_v61  ;;  %v1176_v9 = vmul.f32 %v1173_v3, %v1961_v33  ;;  %v1259_v53 = vld [vmem:[%s2141_s7 + $0x18] sm:$0xff]  ;;  %1353 = vmatpush.msrb.mxu0 %v1332_v58 }
0x1059   :  { %vm1084_vm3 = vmor %vm1082_vm2, %vm1083_vm0  ;;  %1309 = vmatpush.msra.mxu3 %v1259_v53 }
0x105a   :  { %v1079_v62 = vsub.f32 1.0, %v1078_v37  ;;  %v1329_v37 = vld [vmem:[%s2142_s9 + $0x60] sm:$0xff] }
0x105b   :  { %1310 = vmatpush.msra.mxu3 %v1257_v55 }
0x105c   :  { %v1080_v63 = vmul.f32 %v1568_v61, %v1079_v62  ;;  %v1346_v62 = vld [vmem:[%s2142_s9 + $0xe8] sm:$0xff] }
0x105e   :  { %v1081_v0 = vadd.f32 %v1568_v61, %v1080_v63  ;;  %v1328_v63 = vld [vmem:[%s2142_s9 + $0x58] sm:$0xff] }
0x1060   :  { %v1085_v4 = vsel %vm1084_vm3, %v1568_v61, %v1081_v0  ;;  %v1347_v61 = vld [vmem:[%s2142_s9 + $0xf0] sm:$0xff]  ;;  %v1345_v0 = vld [vmem:[%s2142_s9 + $0xe0] sm:$0xff] }
0x1061   :  { %v1090_v7 = vsel %vm1087_vm4, %v1089_v5, %v1085_v4  ;;  %v1326_v4 = vld [vmem:[%s2142_s9 + $0x48] sm:$0xff]  ;;  %v1343_v5 = vld [vmem:[%s2142_s9 + $0xd0] sm:$0xff] }
0x1062   :  { %v1093_v16 = vmul.f32 %v1090_v7, %v1966_v40 }
0x109d   :  { %v1179_v59 = vpop.permute.xlu2 %1178 }
0x109e   :  { %v1181_v60 = vmul.f32 %v1179_v59, %v1173_v3  ;;  %v1331_v59 = vld [vmem:[%s2142_s9 + $0x70] sm:$0xff] }
0x109f   :  { %1354 = vmatpush.msrb.mxu0 %v1331_v59 }
0x10a0   :  { %1183 = vrot.lane.b32.xlu1 %v1181_v60, %s1585_s1  ;;  %v1348_v60 = vld [vmem:[%s2142_s9 + $0xf8] sm:$0xff] }
0x10a1   :  { %1373 = vmatpush.msra.mxu1 %v1348_v60 }
0x10a3   :  { %1374 = vmatpush.msra.mxu1 %v1347_v61 }
0x10a5   :  { %1375 = vmatpush.msra.mxu1 %v1346_v62 }
0x10a7   :  { %1376 = vmatpush.msra.mxu1 %v1345_v0 }
0x10a9   :  { %1377 = vmatpush.msra.mxu1 %v1344_v2 }
0x10ab   :  { %1378 = vmatpush.msra.mxu1 %v1343_v5 }
0x10b6   :  { %v1096_v6 = vpop.permute.xlu1 %1095 }
0x10b7   :  { %v1098_v8 = vmul.f32 %v1096_v6, %v1090_v7  ;;  %v1325_v6 = vld [vmem:[%s2142_s9 + $0x40] sm:$0xff] }
0x10b9   :  { %1100 = vrot.lane.b32.xlu0 %v1098_v8, %s1585_s1  ;;  %v1324_v8 = vld [vmem:[%s2142_s9 + $0x38] sm:$0xff] }
0x1112   :  { %v1184_v10 = vpop.permute.xlu1 %1183 }
0x1113   :  { %v1186_v11 = vadd.f32 %v1184_v10, %v1176_v9  ;;  %v1341_v9 = vld [vmem:[%s2142_s9 + $0xc0] sm:$0xff]  ;;  %v1323_v10 = vld [vmem:[%s2142_s9 + $0x30] sm:$0xff] }
0x1115   :  { %1569 = vtanh.f32 %v1186_v11  ;;  %v1340_v11 = vld [vmem:[%s2142_s9 + $0xb8] sm:$0xff] }
0x111b   :  { %v1570_v12 = vpop.eup %1569 }
0x111c   :  { %1189 = vrot.lane.b32.xlu0 %v1570_v12, %s1585_s1  ;;  %v1322_v12 = vld [vmem:[%s2142_s9 + $0x28] sm:$0xff] }
0x112b   :  { %v1101_v18 = vpop.permute.xlu0 %1100 }
0x112c   :  { %v1103_v19 = vadd.f32 %v1101_v18, %v1093_v16  ;;  %v1339_v16 = vld [vmem:[%s2142_s9 + $0xb0] sm:$0xff]  ;;  %v1321_v18 = vld [vmem:[%s2142_s9 + $0x20] sm:$0xff] }
0x112e   :  { %1571 = vtanh.f32 %v1103_v19 }
0x1134   :  { %v1572_v20 = vpop.eup %1571 }
0x1135   :  { %1106 = vrot.lane.b32.xlu2 %v1572_v20, %s1585_s1  ;;  %v1320_v20 = vld [vmem:[%s2142_s9 + $0x18] sm:$0xff] }
0x118e   :  { %v1190_v31 = vpop.permute.xlu0 %1189 }
0x118f   :  { %v1192_v32 = vmul.f32 %v1190_v31, %v1173_v3  ;;  %v1107_v35 = vpop.permute.xlu2 %1106  ;;  %v1330_v3 = vld [vmem:[%s2142_s9 + $0x68] sm:$0xff]  ;;  %v1337_v31 = vld [vmem:[%s2142_s9 + $0xa0] sm:$0xff] }
0x1190   :  { %v1109_v36 = vmul.f32 %v1107_v35, %v1090_v7  ;;  %1355 = vmatpush.msrb.mxu0 %v1330_v3  ;;  %v1342_v7 = vld [vmem:[%s2142_s9 + $0xc8] sm:$0xff]  ;;  %v1336_v35 = vld [vmem:[%s2142_s9 + $0x98] sm:$0xff] }
0x1191   :  { %1194 = vrot.lane.b32.xlu2 %v1192_v32, %s1586_s25  ;;  %1379 = vmatpush.msra.mxu1 %v1342_v7  ;;  %v1319_v32 = vld [vmem:[%s2142_s9 + $0x10] sm:$0xff] }
0x1192   :  { %1111 = vrot.lane.b32.xlu1 %v1109_v36, %s1586_s25  ;;  %1356 = vmatpush.msrb.mxu0 %v1329_v37  ;;  %v1318_v36 = vld [vmem:[%s2142_s9 + $0x8] sm:$0xff] }
0x1193   :  { %1380 = vmatpush.msra.mxu1 %v1341_v9 }
0x1194   :  { %1357 = vmatpush.msrb.mxu0 %v1328_v63 }
0x1195   :  { %1381 = vmatpush.msra.mxu1 %v1340_v11 }
0x1196   :  { %1358 = vmatpush.msrb.mxu0 %v1327_v1 }
0x1197   :  { %1382 = vmatpush.msra.mxu1 %v1339_v16 }
0x1198   :  { %1359 = vmatpush.msrb.mxu0 %v1326_v4 }
0x119a   :  { %1360 = vmatpush.msrb.mxu0 %v1325_v6 }
0x119c   :  { %1361 = vmatpush.msrb.mxu0 %v1324_v8 }
0x119e   :  { %1362 = vmatpush.msrb.mxu0 %v1323_v10 }
0x11a0   :  { %1363 = vmatpush.msrb.mxu0 %v1322_v12 }
0x11a2   :  { %1364 = vmatpush.msrb.mxu0 %v1321_v18 }
0x11a4   :  { %1365 = vmatpush.msrb.mxu0 %v1320_v20 }
0x11a6   :  { %1366 = vmatpush.msrb.mxu0 %v1319_v32 }
0x11a8   :  { %1367 = vmatpush.msrb.mxu0 %v1318_v36 }
0x11eb   :  { %v1195_v33 = vpop.permute.xlu2 %1194 }
0x11ec   :  { %1444 = vmatmul.msk.f32.vlgmr.msrb.gmra.mxu1 %vm172_vm6, %v1195_v33 }
0x1204   :  { %v1112_v39 = vpop.permute.xlu1 %1111 }
0x1205   :  { %1441 = vmatmul.msk.f32.vlgmr.msrb.gmra.mxu2 %vm172_vm6, %v1112_v39  ;;  %v1335_v39 = vld [vmem:[%s2142_s9 + $0x90] sm:$0xff] }
0x1269   :  { %v1215_v40 = vpop.f32.mrf.mxu1 }
0x1288   :  { %v1132_v41 = vpop.f32.mrf.mxu2 }
0x1289   :  { %v1216_v43 = vadd.f32 %v1215_v40, %v1132_v41  ;;  %v1334_v40 = vld [vmem:[%s2142_s9 + $0x88] sm:$0xff]  ;;  %v1317_v41 = vld [vmem:[%s2142_s9] sm:$0xff] }
0x128a   :  { %1368 = vmatpush.msrb.mxu0 %v1317_v41 }
0x128b   :  { %v1218_v44 = vadd.f32 %v1983_v52, %v1216_v43  ;;  %v1333_v43 = vld [vmem:[%s2142_s9 + $0x80] sm:$0xff] }
0x128d   :  { %1573 = vtanh.f32 %v1218_v44  ;;  %v1445_v34 = vmul.f32 -1.442695, %v1218_v44  ;;  %v1264_v44 = vld [vmem:[%s2144_s8] sm:$0x3] }
0x128f   :  { %1575 = vpow2.f32 %v1445_v34  ;;  %v1267_v34 = vperm.slane %v1264_v44, 1 }
0x1293   :  { %v1574_v45 = vpop.eup %1573 }
0x1294   :  { %1241 = vrot.lane.b32.xlu0 %v1574_v45, %s1585_s1  ;;  %v1266_v45 = vperm.slane %v1264_v44, 0 }
0x1295   :  { %v1576_v42 = vpop.eup %1575 }
0x1296   :  { %v1222_v47 = vadd.f32 1.0, %v1576_v42 }
0x1298   :  { %1577 = vrcp.f32 %v1222_v47  ;;  %v1234_v50 = vand.u32 2147483648, %v1222_v47  ;;  %vm1228_vm7 = vweird.f32 %v1222_v47  ;;  %v1232_v38 = vand.u32 2147483647, %v1222_v47 }
0x129a   :  { %v1235_v52 = vor.u32 1.1754944e-38, %v1234_v50  ;;  %vm1233_vm9 = vcmp.eq.f32.partialorder %v1232_v38, 8.507059e+37 }
0x129e   :  { %v1578_v48 = vpop.eup %1577 }
0x129f   :  { %v1224_v46 = vmul.f32 %v1578_v48, %v1222_v47  ;;  %vm1229_vm5 = vweird.f32 %v1578_v48 }
0x12a0   :  { %vm1230_vm8 = vmor %vm1228_vm7, %vm1229_vm5 }
0x12a1   :  { %v1225_v21 = vsub.f32 1.0, %v1224_v46 }
0x12a3   :  { %v1226_v49 = vmul.f32 %v1578_v48, %v1225_v21 }
0x12a5   :  { %v1227_v22 = vadd.f32 %v1578_v48, %v1226_v49 }
0x12a7   :  { %v1231_v51 = vsel %vm1230_vm8, %v1578_v48, %v1227_v22  ;;  %v1452_v22 = vld [vmem:[%s2143_s10] ss:$0 sm:$0xff] }
0x12a8   :  { %v1236_v27 = vsel %vm1233_vm9, %v1235_v52, %v1231_v51 }
0x12a9   :  { %v1239_v24 = vmul.f32 %v1236_v27, %v1103_v19  ;;  %v1338_v19 = vld [vmem:[%s2142_s9 + $0xa8] sm:$0xff] }
0x12aa   :  { %1383 = vmatpush.msra.mxu1 %v1338_v19 }
0x12ac   :  { %1384 = vmatpush.msra.mxu1 %v1337_v31 }
0x12ae   :  { %1385 = vmatpush.msra.mxu1 %v1336_v35 }
0x12b0   :  { %1386 = vmatpush.msra.mxu1 %v1335_v39 }
0x12b2   :  { %1387 = vmatpush.msra.mxu1 %v1334_v40 }
0x12b4   :  { %1388 = vmatpush.msra.mxu1 %v1333_v43 }
0x1306   :  { %v1242_v23 = vpop.permute.xlu0 %1241 }
0x1307   :  { %v1244_v29 = vmul.f32 %v1242_v23, %v1236_v27 }
0x1309   :  { %1246 = vrot.lane.b32.xlu1 %v1244_v29, %s1585_s1 }
0x137b   :  { %v1247_v25 = vpop.permute.xlu1 %1246 }
0x137c   :  { %v1249_v26 = vadd.f32 %v1247_v25, %v1239_v24 }
0x137e   :  { %1579 = vtanh.f32 %v1249_v26 }
0x1384   :  { %v1580_v13 = vpop.eup %1579 }
0x1385   :  { %1252 = vrot.lane.b32.xlu2 %v1580_v13, %s1585_s1 }
0x13df   :  { %v1253_v56 = vpop.permute.xlu2 %1252 }
0x13e0   :  { %v1255_v57 = vmul.f32 %v1253_v56, %v1236_v27 }
0x13e2   :  { %1271 = vrot.lane.b32.xlu0 %v1255_v57, %s1586_s25 }
0x1454   :  { %v1272_v33 = vpop.permute.xlu0 %1271 }
0x1455   :  { %1446 = vmatmul.msk.f32.vlgmr.msra.gmra.mxu2 %vm172_vm6, %v1272_v33  ;;  %1447 = vmatmul.msk.f32.vlgmr.msra.gmra.mxu3 %vm172_vm6, %v1272_v33 }
0x14d8   :  { %v1292_v42 = vpop.f32.mrf.mxu2  ;;  %v1312_v47 = vpop.f32.mrf.mxu3 }
0x14d9   :  { %v1293_v48 = vadd.f32 %v1292_v42, %v1266_v45  ;;  %v1313_v46 = vadd.f32 %v1312_v47, %v1267_v34 }
0x14db   :  { %v1315_v21 = vmax.f32 %v1293_v48, 0.0  ;;  %v1316_v49 = vmax.f32 %v1313_v46, 0.0 }
0x14dd   :  { %1369 = vmatmul.f32.vlgmr.msrb.gmra.mxu0 %v1315_v21  ;;  %1389 = vmatmul.f32.vlgmr.msra.gmra.mxu1 %v1316_v49 }
0x155a   :  { %v1370_v50 = vpop.f32.mrf.mxu0  ;;  %v1390_v51 = vpop.f32.mrf.mxu1 }
0x155b   :  { %v1371_v38 = vadd.f32 %v1452_v22, %v1370_v50 }
0x155d   :  { %v1391_v52 = vadd.f32 %v1390_v51, %v1371_v38 }
0x155f   :  { %v1393_v23 = vmax.f32 %v1391_v52, 0.0 }
0x1561   :  { %1394 = vst [vmem:[%s2145_s11] sm:$0xff] %v1393_v23 }

</bundles_post_ra>
